<compile_context>
chip_gen: v6e
topology: v6e:2x2x1
jax: 0.10.0
libtpu: 0.0.40
codegen_flags: <defaults>
</compile_context>

<pallas_src>
import math

import jax
import jax.numpy as jnp
from jax.experimental import pallas as pl
from jax.experimental.pallas import tpu as pltpu

# -------- small, TPU-friendly config (same structure as GemmaConfig) ----------
VOCAB = 256
HIDDEN = 128
INTER = 256
N_LAYERS = 2
N_HEADS = 4
N_KV_HEADS = 1
HEAD_DIM = 128
EPS = 1e-6
THETA = 10000.0

Q_OUT = N_HEADS * HEAD_DIM                      # 512
KV_OUT = N_KV_HEADS * HEAD_DIM                  # 128
QKV_OUT = Q_OUT + 2 * KV_OUT                    # 768

# The stacked-head attention trick below shares one K/V across all Q heads.
assert N_KV_HEADS == 1

# TODO(synk): reference does `x * self.norm` where self.norm was overwritten by
# the RMSNorm module (TypeError); the intended scalar hidden_size**0.5 is used.
PRESCALE = float(HIDDEN) ** 0.5


# --------------------- whole-network fused forward kernel ---------------------
def _gemma_forward_kernel(x_ref, cos_ref, sin_ref, mask_ref,
                          wqkv_ref, wo_ref, post_ln_ref, wgu_ref, wd_ref,
                          final_ln_ref, lm_ref, o_ref):
    f32 = jnp.float32
    bf16 = jnp.bfloat16
    T = x_ref.shape[0]
    D = HEAD_DIM
    half = D // 2
    scale = 1.0 / math.sqrt(D)                   # SDPA default scale
    inv_sqrt2 = 1.0 / math.sqrt(2.0)

    # ---- constants shared by every layer: computed & hoisted ONCE ------------
    cos = cos_ref[...]                                               # (T, D) f32
    sin = sin_ref[...]
    # rotate_half(v) == roll(v, D/2, lanes) * [-1 (first half), +1 (second half)]
    # (shift is exactly D/2, so roll direction is immaterial).
    sign = jnp.where(
        jax.lax.broadcasted_iota(jnp.int32, (T, D), 1) < half, -1.0, 1.0
    ).astype(f32)
    # stacked copies for the (H*T, D) query tile — hoisted out of the layer loop
    cos_q = jnp.concatenate([cos] * N_HEADS, axis=0)                 # (H*T, D)
    sin_q = jnp.concatenate([sin] * N_HEADS, axis=0)
    sign_q = jnp.concatenate([sign] * N_HEADS, axis=0)
    mask = mask_ref[...].astype(f32)                                 # (T, T)
    mask_q = jnp.concatenate([mask] * N_HEADS, axis=0)               # (H*T, T)

    def rope(v, c, s, sg):
        return v * c + pltpu.roll(v, shift=half, axis=1) * sg * s

    # residual stream — stays resident for the whole network
    h = x_ref[...].astype(f32) * PRESCALE                            # (T, C)

    for li in range(N_LAYERS):                   # static unroll, N_LAYERS small
        wqkv = wqkv_ref[li]                      # (C, 768)  bf16
        wo = wo_ref[li]                          # (512, C)  bf16
        wgu = wgu_ref[li]                        # (C, 512)  bf16
        wd = wd_ref[li]                          # (256, C)  bf16
        post_ln = post_ln_ref[li].astype(f32)    # (1, C)    f32

        # NOTE: reference computes input_layernorm(x) then immediately
        # overwrites it; the normalized value is never used -> skipped.

        # fused QKV projection: bf16 MXU operands, f32 accumulation
        qkv = jnp.dot(h.astype(bf16), wqkv, preferred_element_type=f32)  # (T, 768)

        # stack the H query heads along rows -> ONE score/softmax/PV per layer
        q = jnp.concatenate(
            [qkv[:, hh * D:(hh + 1) * D] for hh in range(N_HEADS)], axis=0)  # (H*T, D)
        q = rope(q, cos_q, sin_q, sign_q).astype(bf16)
        k = rope(qkv[:, Q_OUT:Q_OUT + KV_OUT], cos, sin, sign).astype(bf16)  # (T, D)
        v = qkv[:, Q_OUT + KV_OUT:]                                          # (T, D) f32

        s = jax.lax.dot_general(q, k, (((1,), (1,)), ((), ())),
                                preferred_element_type=f32)          # (H*T, T)
        s = s * scale + mask_q
        s = s - jnp.max(s, axis=-1, keepdims=True)
        p = jnp.exp(s)
        p = p * pl.reciprocal(jnp.sum(p, axis=-1, keepdims=True), approx=True)
        attn_h = jnp.dot(p, v, preferred_element_type=f32)           # (H*T, D)

        # merge heads back to (T, H*D) before o_proj.
        # TODO(synk): reference applies o_proj to unmerged (B,H,T,D) heads
        # (shape bug); the intended merge is used here.
        y = jnp.concatenate(
            [attn_h[hh * T:(hh + 1) * T, :] for hh in range(N_HEADS)], axis=1)  # (T, 512)

        attn = jnp.dot(y.astype(bf16), wo, preferred_element_type=f32)   # (T, C)

        h = h + attn                                                  # residual add

        # post-attention RMSNorm of the *attention output* (reference quirks:
        # multiplies by sqrt(mean(x^2)+eps), and normalizes y, not the residual)
        ms = jnp.mean(attn * attn, axis=-1, keepdims=True)
        yn = attn * jnp.sqrt(ms + EPS) * (1.0 + post_ln)

        # fused gate|up MLP, exact (erf) GELU, down projection
        gu = jnp.dot(yn.astype(bf16), wgu, preferred_element_type=f32)   # (T, 2*INTER)
        g_act = gu[:, :INTER]
        u_act = gu[:, INTER:]
        g_act = 0.5 * g_act * (1.0 + jax.lax.erf(g_act * inv_sqrt2))
        mlp = jnp.dot((g_act * u_act).astype(bf16), wd,
                      preferred_element_type=f32)                     # (T, C)

        h = h + mlp                                                   # residual add

    # final RMSNorm (same multiply-by-sqrt reference quirk) + lm_head
    ms = jnp.mean(h * h, axis=-1, keepdims=True)
    hn = h * jnp.sqrt(ms + EPS) * (1.0 + final_ln_ref[...].astype(f32))
    o_ref[...] = jnp.dot(hn.astype(bf16), lm_ref[...],
                         preferred_element_type=f32)                  # (T, V)


# ------------------------------ plain-JAX glue ---------------------------------
def rotary_cos_sin(position_ids):
    # GemmaRotaryEmbedding: inv_freq (D/2,), freqs (B, T, D/2), emb=cat(freqs,freqs)
    inv_freq = 1.0 / (THETA ** (jnp.arange(0, HEAD_DIM, 2, dtype=jnp.float32)
                                / HEAD_DIM))
    freqs = position_ids.astype(jnp.float32)[:, :, None] * inv_freq[None, None, :]
    emb = jnp.concatenate([freqs, freqs], axis=-1)       # (B, T, D)
    return jnp.cos(emb), jnp.sin(emb)


def gemma_forward(params, x, attention_mask, position_ids):
    B, T, C = x.shape
    cos, sin = rotary_cos_sin(position_ids)              # computed once for all layers
    cos2d = cos.reshape(B * T, HEAD_DIM)
    sin2d = sin.reshape(B * T, HEAD_DIM)
    mask3d = attention_mask.reshape(B, T, T)
    x2d = x.reshape(B * T, C)

    const3 = lambda b: (0, 0, 0)                          # grid-invariant weights
    const2 = lambda b: (0, 0)

    # kv_cache is None in this forward (reference KVCache.update is broken for
    # layer 0), so the whole forward is a single fused pallas_call.
    logits = pl.pallas_call(
        _gemma_forward_kernel,
        out_shape=jax.ShapeDtypeStruct((B * T, VOCAB), jnp.float32),
        grid=(B,),
        in_specs=[
            pl.BlockSpec((T, C), lambda b: (b, 0)),                    # x
            pl.BlockSpec((T, HEAD_DIM), lambda b: (b, 0)),             # cos
            pl.BlockSpec((T, HEAD_DIM), lambda b: (b, 0)),             # sin
            pl.BlockSpec((pl.Squeezed(), T, T), lambda b: (b, 0, 0)),  # additive mask
            pl.BlockSpec((N_LAYERS, C, QKV_OUT), const3),              # Wqkv (bf16)
            pl.BlockSpec((N_LAYERS, Q_OUT, C), const3),                # Wo (bf16)
            pl.BlockSpec((N_LAYERS, 1, C), const3),                    # post-attn RMSNorm w
            pl.BlockSpec((N_LAYERS, C, 2 * INTER), const3),            # Wgate|Wup (bf16)
            pl.BlockSpec((N_LAYERS, INTER, C), const3),                # Wdown (bf16)
            pl.BlockSpec((1, C), const2),                              # final RMSNorm w
            pl.BlockSpec((C, VOCAB), const2),                          # lm_head (bf16)
        ],
        out_specs=pl.BlockSpec((T, VOCAB), lambda b: (b, 0)),
        compiler_params=pltpu.CompilerParams(
            dimension_semantics=("parallel",)),            # 2-way TC split on v7x
    )(x2d, cos2d, sin2d, mask3d,
      params["wqkv"], params["wo"], params["post_ln"], params["wgu"],
      params["wd"], params["final_ln"], params["lm_head"])
    return logits.reshape(B, T, VOCAB)


# ------------------------------ parameter init ---------------------------------
def init_params(key):
    keys = iter(jax.random.split(key, 8 * N_LAYERS + 4))

    def dense(k, fan_in, fan_out):
        # stored transposed (in, out) so kernels compute x @ W; bf16 for the MXU.
        return (jax.random.normal(k, (fan_in, fan_out), jnp.float32) * 0.02
                ).astype(jnp.bfloat16)

    wqkv_l, wo_l, wgu_l, wd_l, post_ln_l = [], [], [], [], []
    for _ in range(N_LAYERS):
        wq = dense(next(keys), HIDDEN, Q_OUT)
        wk = dense(next(keys), HIDDEN, KV_OUT)
        wv = dense(next(keys), HIDDEN, KV_OUT)
        wqkv_l.append(jnp.concatenate([wq, wk, wv], axis=1))   # fused QKV weight
        wo_l.append(dense(next(keys), Q_OUT, HIDDEN))
        wg = dense(next(keys), HIDDEN, INTER)
        wu = dense(next(keys), HIDDEN, INTER)
        wgu_l.append(jnp.concatenate([wg, wu], axis=1))        # fused gate|up weight
        wd_l.append(dense(next(keys), INTER, HIDDEN))
        post_ln_l.append(jax.random.normal(next(keys), (1, HIDDEN), jnp.float32) * 0.1)

    return {
        "wqkv": jnp.stack(wqkv_l),          # (L, HIDDEN, 768)   bf16
        "wo": jnp.stack(wo_l),              # (L, 512, HIDDEN)   bf16
        "wgu": jnp.stack(wgu_l),            # (L, HIDDEN, 512)   bf16
        "wd": jnp.stack(wd_l),              # (L, INTER, HIDDEN) bf16
        "post_ln": jnp.stack(post_ln_l),    # (L, 1, HIDDEN)     f32
        "final_ln": jax.random.normal(next(keys), (1, HIDDEN), jnp.float32) * 0.1,
        "lm_head": dense(next(keys), HIDDEN, VOCAB),
    }


# ------------------------------------ main --------------------------------------
if __name__ == "__main__":
    B, T = 2, 8
    root = jax.random.PRNGKey(0)
    k_params, k_x = jax.random.split(root)
    params = init_params(k_params)

    # input is already-embedded hidden states (reference forward never calls
    # embed_tokens)
    x = jax.random.normal(k_x, (B, T, HIDDEN), jnp.float32)
    # additive SDPA mask (reference passes is_causal=False and uses the given mask)
    attention_mask = jnp.zeros((B, 1, T, T), jnp.float32)
    position_ids = jnp.broadcast_to(jnp.arange(T, dtype=jnp.int32), (B, T))

    logits = jax.jit(gemma_forward)(params, x, attention_mask, position_ids)
    jax.block_until_ready(logits)
    assert logits.shape == (B, T, VOCAB) and logits.dtype == jnp.float32
    print("KERNEL_OK")
</pallas_src>

<mosaic_0001>
module attributes {stable_mosaic.version = 11 : i64} {
  func.func @_gemma_forward_kernel(%arg0: i32, %arg1: memref<8x128xf32, #tpu.memory_space<vmem>>, %arg2: memref<8x128xf32, #tpu.memory_space<vmem>>, %arg3: memref<8x128xf32, #tpu.memory_space<vmem>>, %arg4: memref<1x8x8xf32, #tpu.memory_space<vmem>>, %arg5: memref<2x128x768xbf16, #tpu.memory_space<vmem>>, %arg6: memref<2x512x128xbf16, #tpu.memory_space<vmem>>, %arg7: memref<2x1x128xf32, #tpu.memory_space<vmem>>, %arg8: memref<2x128x512xbf16, #tpu.memory_space<vmem>>, %arg9: memref<2x256x128xbf16, #tpu.memory_space<vmem>>, %arg10: memref<1x128xf32, #tpu.memory_space<vmem>>, %arg11: memref<128x256xbf16, #tpu.memory_space<vmem>>, %arg12: memref<8x256xf32, #tpu.memory_space<vmem>>) attributes {dimension_semantics = [#tpu.dimension_semantics<parallel>], iteration_bounds = array<i64: 2>, scalar_prefetch = 0 : i64, scratch_operands = 0 : i64, tpu.core_type = #tpu.core_type<tc>, window_params = [{transform_indices = @transform_0, window_bounds = array<i64: 8, 128>}, {transform_indices = @transform_1, window_bounds = array<i64: 8, 128>}, {transform_indices = @transform_2, window_bounds = array<i64: 8, 128>}, {transform_indices = @transform_3, window_bounds = array<i64: 1, 8, 8>}, {pipeline_mode = #tpu.pipeline_mode<synchronous>, transform_indices = @transform_4, window_bounds = array<i64: 2, 128, 768>}, {pipeline_mode = #tpu.pipeline_mode<synchronous>, transform_indices = @transform_5, window_bounds = array<i64: 2, 512, 128>}, {pipeline_mode = #tpu.pipeline_mode<synchronous>, transform_indices = @transform_6, window_bounds = array<i64: 2, 1, 128>}, {pipeline_mode = #tpu.pipeline_mode<synchronous>, transform_indices = @transform_7, window_bounds = array<i64: 2, 128, 512>}, {pipeline_mode = #tpu.pipeline_mode<synchronous>, transform_indices = @transform_8, window_bounds = array<i64: 2, 256, 128>}, {pipeline_mode = #tpu.pipeline_mode<synchronous>, transform_indices = @transform_9, window_bounds = array<i64: 1, 128>}, {pipeline_mode = #tpu.pipeline_mode<synchronous>, transform_indices = @transform_10, window_bounds = array<i64: 128, 256>}, {transform_indices = @transform_11, window_bounds = array<i64: 8, 256>}]} {
    %c0 = arith.constant 0 : index
    %c0_0 = arith.constant 0 : index
    %0 = vector.load %arg2[%c0, %c0_0] : memref<8x128xf32, #tpu.memory_space<vmem>>, vector<8x128xf32>
    %c0_1 = arith.constant 0 : index
    %c0_2 = arith.constant 0 : index
    %1 = vector.load %arg3[%c0_1, %c0_2] : memref<8x128xf32, #tpu.memory_space<vmem>>, vector<8x128xf32>
    %2 = tpu.iota {dimensions = array<i32: 1>} : vector<8x128xi32>
    %c64_i32 = arith.constant 64 : i32
    %3 = vector.broadcast %c64_i32 : i32 to vector<8x128xi32>
    %4 = arith.cmpi slt, %2, %3 : vector<8x128xi32>
    %cst = arith.constant -1.000000e+00 : f32
    %cst_3 = arith.constant 1.000000e+00 : f32
    %5 = vector.broadcast %cst : f32 to vector<8x128xf32>
    %6 = vector.broadcast %cst_3 : f32 to vector<8x128xf32>
    %7 = arith.select %4, %5, %6 : vector<8x128xi1>, vector<8x128xf32>
    %8 = tpu.concatenate %0, %0, %0, %0 in 0 : vector<8x128xf32>, vector<8x128xf32>, vector<8x128xf32>, vector<8x128xf32> -> vector<32x128xf32>
    %9 = tpu.concatenate %1, %1, %1, %1 in 0 : vector<8x128xf32>, vector<8x128xf32>, vector<8x128xf32>, vector<8x128xf32> -> vector<32x128xf32>
    %10 = tpu.concatenate %7, %7, %7, %7 in 0 : vector<8x128xf32>, vector<8x128xf32>, vector<8x128xf32>, vector<8x128xf32> -> vector<32x128xf32>
    %c0_4 = arith.constant 0 : index
    %c0_5 = arith.constant 0 : index
    %c0_6 = arith.constant 0 : index
    %11 = vector.load %arg4[%c0_4, %c0_5, %c0_6] : memref<1x8x8xf32, #tpu.memory_space<vmem>>, vector<1x8x8xf32>
    %12 = vector.shape_cast %11 : vector<1x8x8xf32> to vector<8x8xf32>
    %13 = tpu.concatenate %12, %12, %12, %12 in 0 : vector<8x8xf32>, vector<8x8xf32>, vector<8x8xf32>, vector<8x8xf32> -> vector<32x8xf32>
    %c0_7 = arith.constant 0 : index
    %c0_8 = arith.constant 0 : index
    %14 = vector.load %arg1[%c0_7, %c0_8] : memref<8x128xf32, #tpu.memory_space<vmem>>, vector<8x128xf32>
    %cst_9 = arith.constant 11.3137083 : f32
    %15 = vector.broadcast %cst_9 : f32 to vector<8x128xf32>
    %16 = arith.mulf %14, %15 : vector<8x128xf32>
    %c0_10 = arith.constant 0 : index
    %c0_11 = arith.constant 0 : index
    %c0_12 = arith.constant 0 : index
    %17 = vector.load %arg5[%c0_10, %c0_11, %c0_12] : memref<2x128x768xbf16, #tpu.memory_space<vmem>>, vector<1x128x768xbf16>
    %18 = vector.shape_cast %17 : vector<1x128x768xbf16> to vector<128x768xbf16>
    %c0_13 = arith.constant 0 : index
    %c0_14 = arith.constant 0 : index
    %c0_15 = arith.constant 0 : index
    %19 = vector.load %arg6[%c0_13, %c0_14, %c0_15] : memref<2x512x128xbf16, #tpu.memory_space<vmem>>, vector<1x512x128xbf16>
    %20 = vector.shape_cast %19 : vector<1x512x128xbf16> to vector<512x128xbf16>
    %c0_16 = arith.constant 0 : index
    %c0_17 = arith.constant 0 : index
    %c0_18 = arith.constant 0 : index
    %21 = vector.load %arg8[%c0_16, %c0_17, %c0_18] : memref<2x128x512xbf16, #tpu.memory_space<vmem>>, vector<1x128x512xbf16>
    %22 = vector.shape_cast %21 : vector<1x128x512xbf16> to vector<128x512xbf16>
    %c0_19 = arith.constant 0 : index
    %c0_20 = arith.constant 0 : index
    %c0_21 = arith.constant 0 : index
    %23 = vector.load %arg9[%c0_19, %c0_20, %c0_21] : memref<2x256x128xbf16, #tpu.memory_space<vmem>>, vector<1x256x128xbf16>
    %24 = vector.shape_cast %23 : vector<1x256x128xbf16> to vector<256x128xbf16>
    %c0_22 = arith.constant 0 : index
    %c0_23 = arith.constant 0 : index
    %c0_24 = arith.constant 0 : index
    %25 = vector.load %arg7[%c0_22, %c0_23, %c0_24] : memref<2x1x128xf32, #tpu.memory_space<vmem>>, vector<1x1x128xf32>
    %26 = vector.shape_cast %25 : vector<1x1x128xf32> to vector<1x128xf32>
    %27 = arith.truncf %16 : vector<8x128xf32> to vector<8x128xbf16>
    %cst_25 = arith.constant dense<0.000000e+00> : vector<8x768xf32>
    %28 = tpu.matmul %27, %18, %cst_25 {dimension_numbers = #tpu.dot_dimension_numbers<[1], [0], [0], [1], [0, 0, 1, 1], [], []>} : vector<8x128xbf16>, vector<128x768xbf16>, vector<8x768xf32> -> vector<8x768xf32>
    %29 = vector.extract_strided_slice %28 {offsets = [0, 0], sizes = [8, 128], strides = [1, 1]} : vector<8x768xf32> to vector<8x128xf32>
    %30 = vector.extract_strided_slice %28 {offsets = [0, 128], sizes = [8, 128], strides = [1, 1]} : vector<8x768xf32> to vector<8x128xf32>
    %31 = vector.extract_strided_slice %28 {offsets = [0, 256], sizes = [8, 128], strides = [1, 1]} : vector<8x768xf32> to vector<8x128xf32>
    %32 = vector.extract_strided_slice %28 {offsets = [0, 384], sizes = [8, 128], strides = [1, 1]} : vector<8x768xf32> to vector<8x128xf32>
    %33 = tpu.concatenate %29, %30, %31, %32 in 0 : vector<8x128xf32>, vector<8x128xf32>, vector<8x128xf32>, vector<8x128xf32> -> vector<32x128xf32>
    %34 = arith.mulf %33, %8 : vector<32x128xf32>
    %c64_i32_26 = arith.constant 64 : i32
    %35 = tpu.dynamic_rotate %33 by %c64_i32_26 dim 1 : vector<32x128xf32>, i32 -> vector<32x128xf32>
    %36 = arith.mulf %35, %10 : vector<32x128xf32>
    %37 = arith.mulf %36, %9 : vector<32x128xf32>
    %38 = arith.addf %34, %37 : vector<32x128xf32>
    %39 = arith.truncf %38 : vector<32x128xf32> to vector<32x128xbf16>
    %40 = vector.extract_strided_slice %28 {offsets = [0, 512], sizes = [8, 128], strides = [1, 1]} : vector<8x768xf32> to vector<8x128xf32>
    %41 = arith.mulf %40, %0 : vector<8x128xf32>
    %c64_i32_27 = arith.constant 64 : i32
    %42 = tpu.dynamic_rotate %40 by %c64_i32_27 dim 1 : vector<8x128xf32>, i32 -> vector<8x128xf32>
    %43 = arith.mulf %42, %7 : vector<8x128xf32>
    %44 = arith.mulf %43, %1 : vector<8x128xf32>
    %45 = arith.addf %41, %44 : vector<8x128xf32>
    %46 = arith.truncf %45 : vector<8x128xf32> to vector<8x128xbf16>
    %47 = vector.extract_strided_slice %28 {offsets = [0, 640], sizes = [8, 128], strides = [1, 1]} : vector<8x768xf32> to vector<8x128xf32>
    %cst_28 = arith.constant dense<0.000000e+00> : vector<32x8xf32>
    %48 = tpu.matmul %39, %46, %cst_28 {dimension_numbers = #tpu.dot_dimension_numbers<[1], [1], [0], [0], [0, 0, 1, 0], [], []>} : vector<32x128xbf16>, vector<8x128xbf16>, vector<32x8xf32> -> vector<32x8xf32>
    %cst_29 = arith.constant 0.0883883461 : f32
    %49 = vector.broadcast %cst_29 : f32 to vector<32x8xf32>
    %50 = arith.mulf %48, %49 : vector<32x8xf32>
    %51 = arith.addf %50, %13 : vector<32x8xf32>
    %cst_30 = arith.constant dense<0xFF800000> : vector<32xf32>
    %52 = vector.multi_reduction <maximumf>, %51, %cst_30 [1] : vector<32x8xf32> to vector<32xf32>
    %53 = vector.shape_cast %52 : vector<32xf32> to vector<32x1xf32>
    %54 = vector.broadcast %53 : vector<32x1xf32> to vector<32x8xf32>
    %55 = arith.subf %51, %54 : vector<32x8xf32>
    %56 = math.exp %55 : vector<32x8xf32>
    %cst_31 = arith.constant dense<0.000000e+00> : vector<32xf32>
    %57 = vector.multi_reduction <add>, %56, %cst_31 [1] : vector<32x8xf32> to vector<32xf32>
    %58 = vector.shape_cast %57 : vector<32xf32> to vector<32x1xf32>
    %59 = tpu.reciprocal %58 {approx = true} : vector<32x1xf32> -> vector<32x1xf32>
    %60 = vector.broadcast %59 : vector<32x1xf32> to vector<32x8xf32>
    %61 = arith.mulf %56, %60 : vector<32x8xf32>
    %cst_32 = arith.constant dense<0.000000e+00> : vector<32x128xf32>
    %62 = tpu.matmul %61, %47, %cst_32 {dimension_numbers = #tpu.dot_dimension_numbers<[1], [0], [0], [1], [0, 0, 1, 1], [], []>} : vector<32x8xf32>, vector<8x128xf32>, vector<32x128xf32> -> vector<32x128xf32>
    %63 = vector.extract_strided_slice %62 {offsets = [0, 0], sizes = [8, 128], strides = [1, 1]} : vector<32x128xf32> to vector<8x128xf32>
    %64 = vector.extract_strided_slice %62 {offsets = [8, 0], sizes = [8, 128], strides = [1, 1]} : vector<32x128xf32> to vector<8x128xf32>
    %65 = vector.extract_strided_slice %62 {offsets = [16, 0], sizes = [8, 128], strides = [1, 1]} : vector<32x128xf32> to vector<8x128xf32>
    %66 = vector.extract_strided_slice %62 {offsets = [24, 0], sizes = [8, 128], strides = [1, 1]} : vector<32x128xf32> to vector<8x128xf32>
    %67 = tpu.concatenate %63, %64, %65, %66 in 1 : vector<8x128xf32>, vector<8x128xf32>, vector<8x128xf32>, vector<8x128xf32> -> vector<8x512xf32>
    %68 = arith.truncf %67 : vector<8x512xf32> to vector<8x512xbf16>
    %cst_33 = arith.constant dense<0.000000e+00> : vector<8x128xf32>
    %69 = tpu.matmul %68, %20, %cst_33 {dimension_numbers = #tpu.dot_dimension_numbers<[1], [0], [0], [1], [0, 0, 1, 1], [], []>} : vector<8x512xbf16>, vector<512x128xbf16>, vector<8x128xf32> -> vector<8x128xf32>
    %70 = arith.addf %16, %69 : vector<8x128xf32>
    %71 = arith.mulf %69, %69 : vector<8x128xf32>
    %cst_34 = arith.constant dense<0.000000e+00> : vector<8xf32>
    %72 = vector.multi_reduction <add>, %71, %cst_34 [1] : vector<8x128xf32> to vector<8xf32>
    %73 = vector.shape_cast %72 : vector<8xf32> to vector<8x1xf32>
    %cst_35 = arith.constant 1.280000e+02 : f32
    %74 = vector.broadcast %cst_35 : f32 to vector<8x1xf32>
    %75 = arith.divf %73, %74 : vector<8x1xf32>
    %cst_36 = arith.constant 9.99999997E-7 : f32
    %76 = vector.broadcast %cst_36 : f32 to vector<8x1xf32>
    %77 = arith.addf %75, %76 : vector<8x1xf32>
    %78 = math.sqrt %77 : vector<8x1xf32>
    %79 = vector.broadcast %78 : vector<8x1xf32> to vector<8x128xf32>
    %80 = arith.mulf %69, %79 : vector<8x128xf32>
    %cst_37 = arith.constant 1.000000e+00 : f32
    %81 = vector.broadcast %cst_37 : f32 to vector<1x128xf32>
    %82 = arith.addf %81, %26 : vector<1x128xf32>
    %83 = vector.broadcast %82 : vector<1x128xf32> to vector<8x128xf32>
    %84 = arith.mulf %80, %83 : vector<8x128xf32>
    %85 = arith.truncf %84 : vector<8x128xf32> to vector<8x128xbf16>
    %cst_38 = arith.constant dense<0.000000e+00> : vector<8x512xf32>
    %86 = tpu.matmul %85, %22, %cst_38 {dimension_numbers = #tpu.dot_dimension_numbers<[1], [0], [0], [1], [0, 0, 1, 1], [], []>} : vector<8x128xbf16>, vector<128x512xbf16>, vector<8x512xf32> -> vector<8x512xf32>
    %87 = vector.extract_strided_slice %86 {offsets = [0, 0], sizes = [8, 256], strides = [1, 1]} : vector<8x512xf32> to vector<8x256xf32>
    %88 = vector.extract_strided_slice %86 {offsets = [0, 256], sizes = [8, 256], strides = [1, 1]} : vector<8x512xf32> to vector<8x256xf32>
    %cst_39 = arith.constant 5.000000e-01 : f32
    %89 = vector.broadcast %cst_39 : f32 to vector<8x256xf32>
    %90 = arith.mulf %89, %87 : vector<8x256xf32>
    %cst_40 = arith.constant 0.707106769 : f32
    %91 = vector.broadcast %cst_40 : f32 to vector<8x256xf32>
    %92 = arith.mulf %87, %91 : vector<8x256xf32>
    %93 = math.erf %92 : vector<8x256xf32>
    %cst_41 = arith.constant 1.000000e+00 : f32
    %94 = vector.broadcast %cst_41 : f32 to vector<8x256xf32>
    %95 = arith.addf %94, %93 : vector<8x256xf32>
    %96 = arith.mulf %90, %95 : vector<8x256xf32>
    %97 = arith.mulf %96, %88 : vector<8x256xf32>
    %98 = arith.truncf %97 : vector<8x256xf32> to vector<8x256xbf16>
    %cst_42 = arith.constant dense<0.000000e+00> : vector<8x128xf32>
    %99 = tpu.matmul %98, %24, %cst_42 {dimension_numbers = #tpu.dot_dimension_numbers<[1], [0], [0], [1], [0, 0, 1, 1], [], []>} : vector<8x256xbf16>, vector<256x128xbf16>, vector<8x128xf32> -> vector<8x128xf32>
    %100 = arith.addf %70, %99 : vector<8x128xf32>
    %c1 = arith.constant 1 : index
    %c0_43 = arith.constant 0 : index
    %c0_44 = arith.constant 0 : index
    %101 = vector.load %arg5[%c1, %c0_43, %c0_44] : memref<2x128x768xbf16, #tpu.memory_space<vmem>>, vector<1x128x768xbf16>
    %102 = vector.shape_cast %101 : vector<1x128x768xbf16> to vector<128x768xbf16>
    %c1_45 = arith.constant 1 : index
    %c0_46 = arith.constant 0 : index
    %c0_47 = arith.constant 0 : index
    %103 = vector.load %arg6[%c1_45, %c0_46, %c0_47] : memref<2x512x128xbf16, #tpu.memory_space<vmem>>, vector<1x512x128xbf16>
    %104 = vector.shape_cast %103 : vector<1x512x128xbf16> to vector<512x128xbf16>
    %c1_48 = arith.constant 1 : index
    %c0_49 = arith.constant 0 : index
    %c0_50 = arith.constant 0 : index
    %105 = vector.load %arg8[%c1_48, %c0_49, %c0_50] : memref<2x128x512xbf16, #tpu.memory_space<vmem>>, vector<1x128x512xbf16>
    %106 = vector.shape_cast %105 : vector<1x128x512xbf16> to vector<128x512xbf16>
    %c1_51 = arith.constant 1 : index
    %c0_52 = arith.constant 0 : index
    %c0_53 = arith.constant 0 : index
    %107 = vector.load %arg9[%c1_51, %c0_52, %c0_53] : memref<2x256x128xbf16, #tpu.memory_space<vmem>>, vector<1x256x128xbf16>
    %108 = vector.shape_cast %107 : vector<1x256x128xbf16> to vector<256x128xbf16>
    %c1_54 = arith.constant 1 : index
    %c0_55 = arith.constant 0 : index
    %c0_56 = arith.constant 0 : index
    %109 = vector.load %arg7[%c1_54, %c0_55, %c0_56] : memref<2x1x128xf32, #tpu.memory_space<vmem>>, vector<1x1x128xf32>
    %110 = vector.shape_cast %109 : vector<1x1x128xf32> to vector<1x128xf32>
    %111 = arith.truncf %100 : vector<8x128xf32> to vector<8x128xbf16>
    %cst_57 = arith.constant dense<0.000000e+00> : vector<8x768xf32>
    %112 = tpu.matmul %111, %102, %cst_57 {dimension_numbers = #tpu.dot_dimension_numbers<[1], [0], [0], [1], [0, 0, 1, 1], [], []>} : vector<8x128xbf16>, vector<128x768xbf16>, vector<8x768xf32> -> vector<8x768xf32>
    %113 = vector.extract_strided_slice %112 {offsets = [0, 0], sizes = [8, 128], strides = [1, 1]} : vector<8x768xf32> to vector<8x128xf32>
    %114 = vector.extract_strided_slice %112 {offsets = [0, 128], sizes = [8, 128], strides = [1, 1]} : vector<8x768xf32> to vector<8x128xf32>
    %115 = vector.extract_strided_slice %112 {offsets = [0, 256], sizes = [8, 128], strides = [1, 1]} : vector<8x768xf32> to vector<8x128xf32>
    %116 = vector.extract_strided_slice %112 {offsets = [0, 384], sizes = [8, 128], strides = [1, 1]} : vector<8x768xf32> to vector<8x128xf32>
    %117 = tpu.concatenate %113, %114, %115, %116 in 0 : vector<8x128xf32>, vector<8x128xf32>, vector<8x128xf32>, vector<8x128xf32> -> vector<32x128xf32>
    %118 = arith.mulf %117, %8 : vector<32x128xf32>
    %c64_i32_58 = arith.constant 64 : i32
    %119 = tpu.dynamic_rotate %117 by %c64_i32_58 dim 1 : vector<32x128xf32>, i32 -> vector<32x128xf32>
    %120 = arith.mulf %119, %10 : vector<32x128xf32>
    %121 = arith.mulf %120, %9 : vector<32x128xf32>
    %122 = arith.addf %118, %121 : vector<32x128xf32>
    %123 = arith.truncf %122 : vector<32x128xf32> to vector<32x128xbf16>
    %124 = vector.extract_strided_slice %112 {offsets = [0, 512], sizes = [8, 128], strides = [1, 1]} : vector<8x768xf32> to vector<8x128xf32>
    %125 = arith.mulf %124, %0 : vector<8x128xf32>
    %c64_i32_59 = arith.constant 64 : i32
    %126 = tpu.dynamic_rotate %124 by %c64_i32_59 dim 1 : vector<8x128xf32>, i32 -> vector<8x128xf32>
    %127 = arith.mulf %126, %7 : vector<8x128xf32>
    %128 = arith.mulf %127, %1 : vector<8x128xf32>
    %129 = arith.addf %125, %128 : vector<8x128xf32>
    %130 = arith.truncf %129 : vector<8x128xf32> to vector<8x128xbf16>
    %131 = vector.extract_strided_slice %112 {offsets = [0, 640], sizes = [8, 128], strides = [1, 1]} : vector<8x768xf32> to vector<8x128xf32>
    %cst_60 = arith.constant dense<0.000000e+00> : vector<32x8xf32>
    %132 = tpu.matmul %123, %130, %cst_60 {dimension_numbers = #tpu.dot_dimension_numbers<[1], [1], [0], [0], [0, 0, 1, 0], [], []>} : vector<32x128xbf16>, vector<8x128xbf16>, vector<32x8xf32> -> vector<32x8xf32>
    %cst_61 = arith.constant 0.0883883461 : f32
    %133 = vector.broadcast %cst_61 : f32 to vector<32x8xf32>
    %134 = arith.mulf %132, %133 : vector<32x8xf32>
    %135 = arith.addf %134, %13 : vector<32x8xf32>
    %cst_62 = arith.constant dense<0xFF800000> : vector<32xf32>
    %136 = vector.multi_reduction <maximumf>, %135, %cst_62 [1] : vector<32x8xf32> to vector<32xf32>
    %137 = vector.shape_cast %136 : vector<32xf32> to vector<32x1xf32>
    %138 = vector.broadcast %137 : vector<32x1xf32> to vector<32x8xf32>
    %139 = arith.subf %135, %138 : vector<32x8xf32>
    %140 = math.exp %139 : vector<32x8xf32>
    %cst_63 = arith.constant dense<0.000000e+00> : vector<32xf32>
    %141 = vector.multi_reduction <add>, %140, %cst_63 [1] : vector<32x8xf32> to vector<32xf32>
    %142 = vector.shape_cast %141 : vector<32xf32> to vector<32x1xf32>
    %143 = tpu.reciprocal %142 {approx = true} : vector<32x1xf32> -> vector<32x1xf32>
    %144 = vector.broadcast %143 : vector<32x1xf32> to vector<32x8xf32>
    %145 = arith.mulf %140, %144 : vector<32x8xf32>
    %cst_64 = arith.constant dense<0.000000e+00> : vector<32x128xf32>
    %146 = tpu.matmul %145, %131, %cst_64 {dimension_numbers = #tpu.dot_dimension_numbers<[1], [0], [0], [1], [0, 0, 1, 1], [], []>} : vector<32x8xf32>, vector<8x128xf32>, vector<32x128xf32> -> vector<32x128xf32>
    %147 = vector.extract_strided_slice %146 {offsets = [0, 0], sizes = [8, 128], strides = [1, 1]} : vector<32x128xf32> to vector<8x128xf32>
    %148 = vector.extract_strided_slice %146 {offsets = [8, 0], sizes = [8, 128], strides = [1, 1]} : vector<32x128xf32> to vector<8x128xf32>
    %149 = vector.extract_strided_slice %146 {offsets = [16, 0], sizes = [8, 128], strides = [1, 1]} : vector<32x128xf32> to vector<8x128xf32>
    %150 = vector.extract_strided_slice %146 {offsets = [24, 0], sizes = [8, 128], strides = [1, 1]} : vector<32x128xf32> to vector<8x128xf32>
    %151 = tpu.concatenate %147, %148, %149, %150 in 1 : vector<8x128xf32>, vector<8x128xf32>, vector<8x128xf32>, vector<8x128xf32> -> vector<8x512xf32>
    %152 = arith.truncf %151 : vector<8x512xf32> to vector<8x512xbf16>
    %cst_65 = arith.constant dense<0.000000e+00> : vector<8x128xf32>
    %153 = tpu.matmul %152, %104, %cst_65 {dimension_numbers = #tpu.dot_dimension_numbers<[1], [0], [0], [1], [0, 0, 1, 1], [], []>} : vector<8x512xbf16>, vector<512x128xbf16>, vector<8x128xf32> -> vector<8x128xf32>
    %154 = arith.addf %100, %153 : vector<8x128xf32>
    %155 = arith.mulf %153, %153 : vector<8x128xf32>
    %cst_66 = arith.constant dense<0.000000e+00> : vector<8xf32>
    %156 = vector.multi_reduction <add>, %155, %cst_66 [1] : vector<8x128xf32> to vector<8xf32>
    %157 = vector.shape_cast %156 : vector<8xf32> to vector<8x1xf32>
    %cst_67 = arith.constant 1.280000e+02 : f32
    %158 = vector.broadcast %cst_67 : f32 to vector<8x1xf32>
    %159 = arith.divf %157, %158 : vector<8x1xf32>
    %cst_68 = arith.constant 9.99999997E-7 : f32
    %160 = vector.broadcast %cst_68 : f32 to vector<8x1xf32>
    %161 = arith.addf %159, %160 : vector<8x1xf32>
    %162 = math.sqrt %161 : vector<8x1xf32>
    %163 = vector.broadcast %162 : vector<8x1xf32> to vector<8x128xf32>
    %164 = arith.mulf %153, %163 : vector<8x128xf32>
    %cst_69 = arith.constant 1.000000e+00 : f32
    %165 = vector.broadcast %cst_69 : f32 to vector<1x128xf32>
    %166 = arith.addf %165, %110 : vector<1x128xf32>
    %167 = vector.broadcast %166 : vector<1x128xf32> to vector<8x128xf32>
    %168 = arith.mulf %164, %167 : vector<8x128xf32>
    %169 = arith.truncf %168 : vector<8x128xf32> to vector<8x128xbf16>
    %cst_70 = arith.constant dense<0.000000e+00> : vector<8x512xf32>
    %170 = tpu.matmul %169, %106, %cst_70 {dimension_numbers = #tpu.dot_dimension_numbers<[1], [0], [0], [1], [0, 0, 1, 1], [], []>} : vector<8x128xbf16>, vector<128x512xbf16>, vector<8x512xf32> -> vector<8x512xf32>
    %171 = vector.extract_strided_slice %170 {offsets = [0, 0], sizes = [8, 256], strides = [1, 1]} : vector<8x512xf32> to vector<8x256xf32>
    %172 = vector.extract_strided_slice %170 {offsets = [0, 256], sizes = [8, 256], strides = [1, 1]} : vector<8x512xf32> to vector<8x256xf32>
    %cst_71 = arith.constant 5.000000e-01 : f32
    %173 = vector.broadcast %cst_71 : f32 to vector<8x256xf32>
    %174 = arith.mulf %173, %171 : vector<8x256xf32>
    %cst_72 = arith.constant 0.707106769 : f32
    %175 = vector.broadcast %cst_72 : f32 to vector<8x256xf32>
    %176 = arith.mulf %171, %175 : vector<8x256xf32>
    %177 = math.erf %176 : vector<8x256xf32>
    %cst_73 = arith.constant 1.000000e+00 : f32
    %178 = vector.broadcast %cst_73 : f32 to vector<8x256xf32>
    %179 = arith.addf %178, %177 : vector<8x256xf32>
    %180 = arith.mulf %174, %179 : vector<8x256xf32>
    %181 = arith.mulf %180, %172 : vector<8x256xf32>
    %182 = arith.truncf %181 : vector<8x256xf32> to vector<8x256xbf16>
    %cst_74 = arith.constant dense<0.000000e+00> : vector<8x128xf32>
    %183 = tpu.matmul %182, %108, %cst_74 {dimension_numbers = #tpu.dot_dimension_numbers<[1], [0], [0], [1], [0, 0, 1, 1], [], []>} : vector<8x256xbf16>, vector<256x128xbf16>, vector<8x128xf32> -> vector<8x128xf32>
    %184 = arith.addf %154, %183 : vector<8x128xf32>
    %185 = arith.mulf %184, %184 : vector<8x128xf32>
    %cst_75 = arith.constant dense<0.000000e+00> : vector<8xf32>
    %186 = vector.multi_reduction <add>, %185, %cst_75 [1] : vector<8x128xf32> to vector<8xf32>
    %187 = vector.shape_cast %186 : vector<8xf32> to vector<8x1xf32>
    %cst_76 = arith.constant 1.280000e+02 : f32
    %188 = vector.broadcast %cst_76 : f32 to vector<8x1xf32>
    %189 = arith.divf %187, %188 : vector<8x1xf32>
    %cst_77 = arith.constant 9.99999997E-7 : f32
    %190 = vector.broadcast %cst_77 : f32 to vector<8x1xf32>
    %191 = arith.addf %189, %190 : vector<8x1xf32>
    %192 = math.sqrt %191 : vector<8x1xf32>
    %193 = vector.broadcast %192 : vector<8x1xf32> to vector<8x128xf32>
    %194 = arith.mulf %184, %193 : vector<8x128xf32>
    %c0_78 = arith.constant 0 : index
    %c0_79 = arith.constant 0 : index
    %195 = vector.load %arg10[%c0_78, %c0_79] : memref<1x128xf32, #tpu.memory_space<vmem>>, vector<1x128xf32>
    %cst_80 = arith.constant 1.000000e+00 : f32
    %196 = vector.broadcast %cst_80 : f32 to vector<1x128xf32>
    %197 = arith.addf %196, %195 : vector<1x128xf32>
    %198 = vector.broadcast %197 : vector<1x128xf32> to vector<8x128xf32>
    %199 = arith.mulf %194, %198 : vector<8x128xf32>
    %200 = arith.truncf %199 : vector<8x128xf32> to vector<8x128xbf16>
    %c0_81 = arith.constant 0 : index
    %c0_82 = arith.constant 0 : index
    %201 = vector.load %arg11[%c0_81, %c0_82] : memref<128x256xbf16, #tpu.memory_space<vmem>>, vector<128x256xbf16>
    %cst_83 = arith.constant dense<0.000000e+00> : vector<8x256xf32>
    %202 = tpu.matmul %200, %201, %cst_83 {dimension_numbers = #tpu.dot_dimension_numbers<[1], [0], [0], [1], [0, 0, 1, 1], [], []>} : vector<8x128xbf16>, vector<128x256xbf16>, vector<8x256xf32> -> vector<8x256xf32>
    %c0_84 = arith.constant 0 : index
    %c0_85 = arith.constant 0 : index
    %203 = vector.load %arg12[%c0_84, %c0_85] : memref<8x256xf32, #tpu.memory_space<vmem>>, vector<8x256xf32>
    tpu.vector_store %arg12[%c0_84, %c0_85], %202 {strides = array<i32>} : memref<8x256xf32, #tpu.memory_space<vmem>>, vector<8x256xf32>,
    return
  }
  func.func @transform_0(%arg0: i32) -> (i32, i32) {
    %c0_i32 = arith.constant 0 : i32
    %c0_i32_0 = arith.constant 0 : i32
    return %arg0, %c0_i32 : i32, i32
  }
  func.func @transform_1(%arg0: i32) -> (i32, i32) {
    %c0_i32 = arith.constant 0 : i32
    %c0_i32_0 = arith.constant 0 : i32
    return %arg0, %c0_i32 : i32, i32
  }
  func.func @transform_2(%arg0: i32) -> (i32, i32) {
    %c0_i32 = arith.constant 0 : i32
    %c0_i32_0 = arith.constant 0 : i32
    return %arg0, %c0_i32 : i32, i32
  }
  func.func @transform_3(%arg0: i32) -> (i32, i32, i32) {
    %c0_i32 = arith.constant 0 : i32
    %c0_i32_0 = arith.constant 0 : i32
    %c0_i32_1 = arith.constant 0 : i32
    return %arg0, %c0_i32, %c0_i32_0 : i32, i32, i32
  }
  func.func @transform_4(%arg0: i32) -> (i32, i32, i32) {
    %c0_i32 = arith.constant 0 : i32
    %c0_i32_0 = arith.constant 0 : i32
    %c0_i32_1 = arith.constant 0 : i32
    %c0_i32_2 = arith.constant 0 : i32
    return %c0_i32, %c0_i32_0, %c0_i32_1 : i32, i32, i32
  }
  func.func @transform_5(%arg0: i32) -> (i32, i32, i32) {
    %c0_i32 = arith.constant 0 : i32
    %c0_i32_0 = arith.constant 0 : i32
    %c0_i32_1 = arith.constant 0 : i32
    %c0_i32_2 = arith.constant 0 : i32
    return %c0_i32, %c0_i32_0, %c0_i32_1 : i32, i32, i32
  }
  func.func @transform_6(%arg0: i32) -> (i32, i32, i32) {
    %c0_i32 = arith.constant 0 : i32
    %c0_i32_0 = arith.constant 0 : i32
    %c0_i32_1 = arith.constant 0 : i32
    %c0_i32_2 = arith.constant 0 : i32
    return %c0_i32, %c0_i32_0, %c0_i32_1 : i32, i32, i32
  }
  func.func @transform_7(%arg0: i32) -> (i32, i32, i32) {
    %c0_i32 = arith.constant 0 : i32
    %c0_i32_0 = arith.constant 0 : i32
    %c0_i32_1 = arith.constant 0 : i32
    %c0_i32_2 = arith.constant 0 : i32
    return %c0_i32, %c0_i32_0, %c0_i32_1 : i32, i32, i32
  }
  func.func @transform_8(%arg0: i32) -> (i32, i32, i32) {
    %c0_i32 = arith.constant 0 : i32
    %c0_i32_0 = arith.constant 0 : i32
    %c0_i32_1 = arith.constant 0 : i32
    %c0_i32_2 = arith.constant 0 : i32
    return %c0_i32, %c0_i32_0, %c0_i32_1 : i32, i32, i32
  }
  func.func @transform_9(%arg0: i32) -> (i32, i32) {
    %c0_i32 = arith.constant 0 : i32
    %c0_i32_0 = arith.constant 0 : i32
    %c0_i32_1 = arith.constant 0 : i32
    return %c0_i32, %c0_i32_0 : i32, i32
  }
  func.func @transform_10(%arg0: i32) -> (i32, i32) {
    %c0_i32 = arith.constant 0 : i32
    %c0_i32_0 = arith.constant 0 : i32
    %c0_i32_1 = arith.constant 0 : i32
    return %c0_i32, %c0_i32_0 : i32, i32
  }
  func.func @transform_11(%arg0: i32) -> (i32, i32) {
    %c0_i32 = arith.constant 0 : i32
    %c0_i32_0 = arith.constant 0 : i32
    return %arg0, %c0_i32 : i32, i32
  }
}

</mosaic_0001>

<bundles_post_ra>
// kernel: gemma_forward.1
= control target key start
LH: loop header
LB: loop body
LE: loop exit
PB: predicated region body
PF: predicated region fallthrough
CT: control target
= control target key end

     0   :  { %s5354_s0 = inlined_call_operand.vmem [shape: f32[16,128], index: 0, kind: input, shape index: {}]   ;;  %s5355_s1 = inlined_call_operand.vmem [shape: f32[16,128], index: 1, kind: input, shape index: {}]   ;;  %s5356_s2 = inlined_call_operand.vmem [shape: f32[16,128], index: 2, kind: input, shape index: {}]   ;;  %s5357_s3 = inlined_call_operand.vmem [shape: f32[2,8,8], index: 3, kind: input, shape index: {}]   ;;  %s5358_s4 = inlined_call_operand.hbm [shape: bf16[2,128,768], index: 4, kind: input, shape index: {}]   ;;  %s5359_s5 = inlined_call_operand.hbm [shape: bf16[2,512,128], index: 5, kind: input, shape index: {}]   ;;  %s5360_s6 = inlined_call_operand.vmem [shape: f32[2,1,128], index: 6, kind: input, shape index: {}]   ;;  %s5361_s7 = inlined_call_operand.hbm [shape: bf16[2,128,512], index: 7, kind: input, shape index: {}]   ;;  %s5362_s8 = inlined_call_operand.hbm [shape: bf16[2,256,128], index: 8, kind: input, shape index: {}]   ;;  %s5363_s9 = inlined_call_operand.vmem [shape: f32[1,128], index: 9, kind: input, shape index: {}]   ;;  %s5364_s10 = inlined_call_operand.hbm [shape: bf16[128,256], index: 10, kind: input, shape index: {}]   ;;  %s5365_s11 = inlined_call_operand.hbm [shape: f32[16,256], index: 11, kind: output, shape index: {}]  }
   0x1   :  { %5372 = sst [smem:[#allocation19_spill]] %s5358_s4 }
   0x2   :  { %16 = vsyncpa [#allocation3], 0 }
   0x3   :  { %17 = vsyncpa [#allocation6], 0 }
   0x4   :  { %18 = vsyncpa [#allocation9], 0 }
   0x5   :  { %19 = vsyncpa [#allocation4], 0 }
   0x6   :  { %21 = vsyncpa [#allocation4 + $0x1], 0  ;;  %s5043_s17 = smov 0   ;;  %s5045_s18 = smov 0  }
   0x7   :  { %s5047_s19 = smov 0   ;;  %s5049_s20 = smov 0  }
   0x8 LB: > { %5373 = sst [smem:[#allocation16_spill]] %s4960_s19  ;;  %s5064_s21 = sadd.s32 4294967295, %s4964_s20   ;;  %s4964_s20 = sphi %s5049_s20, %s5391_s20   ;;  %s4960_s19 = sphi %s5047_s19, %s5393_s19   ;;  %s4956_s18 = sphi %s5045_s18, %s5395_s18   ;;  %s4952_s17 = sphi %s5043_s17, %s5394_s17  }
   0x9   : > { %s3773_s22 = sadd.s32 4294967294, %s4964_s20   ;;  %s5068_s23 = sadd.s32 1, %s4964_s20  }
   0xa   : > { %5374 = sst [smem:[#allocation17_spill]] %s5068_s23  ;;  %s285_s24 = sadd.s32 1, %s4960_s19 }
   0xb   : > { %s282_s25 = ssub.s32 %s4964_s20, %s5068_s23  ;;  %p295_p0 = scmp.ne.s32.totalorder %s4960_s19, %s4956_s18 }
   0xc   : > { %p283_p1 = scmp.eq.s32.totalorder %s282_s25, 0  ;;  %p296_p2 = scmp.eq.s32.totalorder %s5064_s21, 1 }
   0xd   : > { %p301_p3 = scmp.ne.s32.totalorder %s4956_s18, %s4952_s17  ;;  %p302_p4 = scmp.eq.s32.totalorder %s3773_s22, 1 }
   0xe   : > { %s5079_s26 = scalar_select %p283_p1, %s4960_s19, %s285_s24  }
   0xf   : > { %p5081_p5 = por %p296_p2, %p295_p0  ;;  %p5085_p6 = por %p302_p4, %p301_p3 }
  0x10   : > { %5375 = sst [smem:[#allocation18_spill]] %s5079_s26  ;;  %p3774_p7 = scmp.ge.s32.totalorder %s4964_s20, 1 }
  0x11   : > { %s5376_s27 = scalar_select %p5081_p5, 1, 0 }
  0x12   : > { %s5377_s28 = scalar_select %p5085_p6, 1, 0 }
  0x13   : > { %p309_p8 = scmp.lt.s32.totalorder %s4964_s20, 3  ;;  %p5367_p9 = scmp.eq.s32.totalorder %s5064_s21, 0 }
  0x14   : > { %s4966_s30 = smov [#allocation5]   ;;  %s4967_s14 = smov [#allocation8]  }
  0x15   : > { %p5092_p10 = pnand %p3774_p7, %p309_p8  ;;  %s334_s12 = sshll.u32 %s4966_s30, 4  ;;  %s335_s12 = int_to_ptr.vmem [resolvable:$true] %s334_s12 }
  0x16   : > { %s363_s15 = sshll.u32 %s4967_s14, 4  ;;  %s4968_s16 = smov [#allocation2]   ;;  %s364_s15 = int_to_ptr.vmem [resolvable:$true] %s363_s15 }
  0x17   : > { %s5378_s29 = scalar_select %p5092_p10, 1, 0 }
  0x18   : > { %p4277_p11 = pneg %p5092_p10  ;;  %s321_s22 = sshll.u32 %s4968_s16, 4  ;;  %s322_s22 = int_to_ptr.vmem [resolvable:$true] %s321_s22 }
  0x19   : > { %s4773_s25 = scalar_lea.vmem %s335_s12, 8192  ;;  %p4781_p3 = scmp.lt.s32.totalorder %s335_s12, %s335_s12 }
  0x1a   : > { %p5100_p12 = pnand %p5367_p9, %p4277_p11  ;;  %p4774_p0 = scmp.ne.s32.totalorder %s335_s12, %s4773_s25 }
  0x1b   : > { %p4782_p4 = scmp.lt.s32.totalorder %s4773_s25, %s4773_s25 }
  0x1c   : > { %p5106_p13 = pneg %p5100_p12 }
  0x1d   : > { %p4783_p7 = por %p4782_p4, %p4781_p3 }
  0x1e   : > { %p4776_p1 = pnand %p4774_p0, %p5106_p13 }
  0x20   : > { %p4777_p2 = pneg %p4776_p1 }
  0x22   : > { %p4784_p8 = pnand %p4783_p7, %p4777_p2 }
  0x24   : > { %4787 = shalt.err (!%p4784_p8)
}
  0x25   : > { %s4969_s30 = smov 64   ;;  %s4970_s14 = smov 4  }
  0x26   : > { %4283 = dma.hbm_to_vmem [thread:$0]  (!%p5100_p12), %s5359_s5, 8192, %s335_s12, [#allocation6], %s4969_s30, %s4969_s30, %s4970_s14  }
  0x27   : > { %s4799_s19 = scalar_lea.vmem %s364_s15, 4096  ;;  %p4807_p1 = scmp.lt.s32.totalorder %s364_s15, %s364_s15 }
  0x28   : > { %p4800_p11 = scmp.ne.s32.totalorder %s364_s15, %s4799_s19  ;;  %p4808_p6 = scmp.lt.s32.totalorder %s4799_s19, %s4799_s19 }
  0x2a   : > { %p4802_p9 = pnand %p4800_p11, %p5106_p13  ;;  %p4809_p5 = por %p4808_p6, %p4807_p1 }
  0x2c   : > { %p4803_p0 = pneg %p4802_p9 }
  0x2e   : > { %p4810_p3 = pnand %p4809_p5, %p4803_p0 }
  0x30   : > { %4813 = shalt.err (!%p4810_p3)
}
  0x31   : > { %4289 = dma.hbm_to_vmem [thread:$0]  (!%p5100_p12), %s5362_s8, 4096, %s364_s15, [#allocation9], %s4969_s30, %s4969_s30, %s4970_s14  }
  0x32   : > { %s4825_s26 = scalar_lea.vmem %s322_s22, 12288  ;;  %p4833_p8 = scmp.lt.s32.totalorder %s322_s22, %s322_s22 }
  0x33   : > { %p4826_p2 = scmp.ne.s32.totalorder %s322_s22, %s4825_s26  ;;  %p4834_p9 = scmp.lt.s32.totalorder %s4825_s26, %s4825_s26 }
  0x35   : > { %p4828_p4 = pnand %p4826_p2, %p5106_p13  ;;  %p4835_p11 = por %p4834_p9, %p4833_p8 }
  0x37   : > { %p4829_p7 = pneg %p4828_p4 }
  0x39   : > { %p4836_p10 = pnand %p4835_p11, %p4829_p7 }
  0x3b   : > { %4839 = shalt.err (!%p4836_p10)
}
  0x3c   : > { %s4971_s19 = smov 384   ;;  %s4972_s12 = smov 24  }
  0x3d   : > { %s5381_s4 = sld [smem:[#allocation19_spill]]  ;;  %s4973_s15 = smov [#allocation7]  }
  0x3e   : > { %s350_s30 = sshll.u32 %s4973_s15, 4  ;;  %s351_s30 = int_to_ptr.vmem [resolvable:$true] %s350_s30 }
  0x3f   : > { %s4851_s14 = scalar_lea.vmem %s351_s30, 8192  ;;  %p4859_p1 = scmp.lt.s32.totalorder %s351_s30, %s351_s30 }
  0x40   : > { %p4852_p5 = scmp.ne.s32.totalorder %s351_s30, %s4851_s14  ;;  %p4860_p3 = scmp.lt.s32.totalorder %s4851_s14, %s4851_s14 }
  0x42   : > { %p4854_p6 = pnand %p4852_p5, %p5106_p13  ;;  %p4861_p10 = por %p4860_p3, %p4859_p1 }
  0x43   : > { %4280 = dma.hbm_to_vmem [thread:$0]  (!%p5100_p12), %s5381_s4, 12288, %s322_s22, [#allocation3], %s4971_s19, %s4971_s19, %s4972_s12  }
  0x44   : > { %p4855_p0 = pneg %p4854_p6 }
  0x46   : > { %p4862_p2 = pnand %p4861_p10, %p4855_p0 }
  0x48   : > { %4865 = shalt.err (!%p4862_p2)
}
  0x49   : > { %s4974_s25 = smov 256   ;;  %s4975_s26 = smov 16  }
  0x4a   : > { %4286 = dma.hbm_to_vmem [thread:$0]  (!%p5100_p12), %s5361_s7, 8192, %s351_s30, [#allocation6], %s4974_s25, %s4974_s25, %s4975_s26  }
  0x4b   : > { %s4976_s19 = smov [#allocation10]  }
  0x4c   : > { %s379_s12 = sshll.u32 %s4976_s19, 4  ;;  %s380_s12 = int_to_ptr.vmem [resolvable:$true] %s379_s12 }
  0x4d   : > { %s4877_s23 = scalar_lea.vmem %s380_s12, 2048  ;;  %p4885_p9 = scmp.lt.s32.totalorder %s380_s12, %s380_s12 }
  0x4e   : > { %p4878_p4 = scmp.ne.s32.totalorder %s380_s12, %s4877_s23  ;;  %p4886_p11 = scmp.lt.s32.totalorder %s4877_s23, %s4877_s23 }
  0x50   : > { %p4880_p7 = pnand %p4878_p4, %p5106_p13  ;;  %p4887_p5 = por %p4886_p11, %p4885_p9 }
  0x52   : > { %p4881_p8 = pneg %p4880_p7 }
  0x54   : > { %p4888_p6 = pnand %p4887_p5, %p4881_p8 }
  0x56   : > { %4891 = shalt.err (!%p4888_p6)
}
  0x57   : > { %s4977_s15 = smov 128   ;;  %s4978_s14 = smov 8  }
  0x58   : > { %4292 = dma.hbm_to_vmem [thread:$0]  (!%p5100_p12), %s5364_s10, 2048, %s380_s12, [#allocation9], %s4977_s15, %s4977_s15, %s4978_s14  }
  0x59   : > { %p5382_p0 = scmp.ne.s32.totalorder %s5378_s29, 0 }
  0x5a   : > { %p5383_p1 = scmp.eq.s32.totalorder (!%p5382_p0), %s5064_s21, 0 }
  0x5b   : > { %423 = sbr.rel (%p5382_p0) target bundleno = 4234 (0x108a), region = 64 }
  0x60   : > { %4935 = dma.done.wait (%p5383_p1), [#allocation3], 12288   ;;  %p5384_p13 = pmov %p5383_p1 }
  0x61   : > { %p5385_p3 = pmov %p5383_p1 }
  0x62   : > { %4937 = vsyncadd (%p5384_p13), [#allocation3], 4294955008 }
  0x63   : > { %4939 = dma.done.wait (%p5385_p3), [#allocation6], 16384   ;;  %p5386_p10 = pmov %p5383_p1 }
  0x64   : > { %p5387_p2 = pmov %p5383_p1 }
  0x65   : > { %4941 = vsyncadd (%p5386_p10), [#allocation6], 4294950912 }
  0x66   : > { %4943 = dma.done.wait (%p5387_p2), [#allocation9], 6144   ;;  %p5388_p12 = pmov %p5383_p1 }
  0x67   : > { %v4979_v0 = vmov 0   ;;  %v4356_v1 = vld [vmem:[#allocation2 + $0x154] ss:$24 sps:$4 sm:$0xff]   ;;  %v4358_v2 = vld [vmem:[#allocation2 + $0x150] ss:$24 sps:$4 sm:$0xff]   ;;  %p490_p4 = scmp.lt.s32.totalorder %s5064_s21, 1 }
  0x68   : > { %4945 = vsyncadd (%p5388_p12), [#allocation9], 4294961152  ;;  %966 = vmatprep.mubr.bf16.mxu0 %v4979_v0  ;;  %1007 = vmatprep.mubr.bf16.mxu1 %v4979_v0  ;;  %v4359_v3 = vld [vmem:[#allocation2 + $0x124] ss:$24 sps:$4 sm:$0xff]   ;;  %v4361_v4 = vld [vmem:[#allocation2 + $0x120] ss:$24 sps:$4 sm:$0xff]  }
  0x69   : > { %934 = vmatprep.subr.bf16.mxu0 %v4356_v1  ;;  %v4362_v5 = vld [vmem:[#allocation2 + $0x15c] ss:$24 sps:$4 sm:$0xff]   ;;  %v4364_v6 = vld [vmem:[#allocation2 + $0x158] ss:$24 sps:$4 sm:$0xff]   ;;  %v4368_v8 = vld [vmem:[#allocation2 + $0x12c] ss:$24 sps:$4 sm:$0xff]   ;;  %v509_v1 = vlaneseq }
  0x6a   : > { %935 = vmatpush1.bf16.msra.mxu0 %v4358_v2  ;;  %v4365_v7 = vld [vmem:[#allocation2 + $0xf4] ss:$24 sps:$4 sm:$0xff]   ;;  %975 = vmatprep.subr.bf16.mxu1 %v4362_v5  ;;  %v4370_v9 = vld [vmem:[#allocation2 + $0x128] ss:$24 sps:$4 sm:$0xff]   ;;  %v4371_v11 = vld [vmem:[#allocation2 + $0xc4] ss:$24 sps:$4 sm:$0xff]  }
  0x6b   : > { %936 = vmatprep.subr.bf16.mxu0 %v4359_v3  ;;  %976 = vmatpush1.bf16.msra.mxu1 %v4364_v6  ;;  %v4367_v10 = vld [vmem:[#allocation2 + $0xf0] ss:$24 sps:$4 sm:$0xff]   ;;  %v4374_v12 = vld [vmem:[#allocation2 + $0xfc] ss:$24 sps:$4 sm:$0xff]   ;;  %v4373_v14 = vld [vmem:[#allocation2 + $0xc0] ss:$24 sps:$4 sm:$0xff]  }
  0x6c   : > { %977 = vmatprep.subr.bf16.mxu1 %v4368_v8  ;;  %v4376_v13 = vld [vmem:[#allocation2 + $0xf8] ss:$24 sps:$4 sm:$0xff]   ;;  %v4380_v15 = vld [vmem:[#allocation2 + $0xcc] ss:$24 sps:$4 sm:$0xff]   ;;  %s491_s4 = scalar_select %p490_p4, %s5064_s21, 1  ;;  %v510_v2 = vand.u32 127, %v509_v1 }
  0x6d   : > { %v4377_v16 = vld [vmem:[#allocation2 + $0x94] ss:$24 sps:$4 sm:$0xff]   ;;  %v4382_v17 = vld [vmem:[#allocation2 + $0xc8] ss:$24 sps:$4 sm:$0xff]   ;;  %v4383_v20 = vld [vmem:[#allocation2 + $0x64] ss:$24 sps:$4 sm:$0xff]  }
  0x6e   : > { %937 = vmatpush1.bf16.msra.mxu0 %v4361_v4  ;;  %v4379_v18 = vld [vmem:[#allocation2 + $0x90] ss:$24 sps:$4 sm:$0xff]   ;;  %v4386_v19 = vld [vmem:[#allocation2 + $0x9c] ss:$24 sps:$4 sm:$0xff]   ;;  %s5163_s29 = sshll.u32 %s491_s4, 3  ;;  %s4980_s25 = smov 64  }
  0x6f   : > { %938 = vmatprep.subr.bf16.mxu0 %v4365_v7  ;;  %978 = vmatpush1.bf16.msra.mxu1 %v4370_v9  ;;  %v4388_v21 = vld [vmem:[#allocation2 + $0x98] ss:$24 sps:$4 sm:$0xff]   ;;  %v4392_v23 = vld [vmem:[#allocation2 + $0x6c] ss:$24 sps:$4 sm:$0xff]   ;;  %s493_s30 = scalar_lea.vmem %s5354_s0, %s5163_s29  ;;  %v4394_v26 = vld [vmem:[#allocation2 + $0x68] ss:$24 sps:$4 sm:$0xff]   ;;  %s497_s19 = scalar_lea.vmem %s5355_s1, %s5163_s29 }
  0x70   : > { %979 = vmatprep.subr.bf16.mxu1 %v4374_v12  ;;  %v4385_v22 = vld [vmem:[#allocation2 + $0x60] ss:$24 sps:$4 sm:$0xff]   ;;  %v4389_v24 = vld [vmem:[#allocation2 + $0x34] ss:$24 sps:$4 sm:$0xff]   ;;  %v4391_v25 = vld [vmem:[#allocation2 + $0x30] ss:$24 sps:$4 sm:$0xff]   ;;  %s501_s15 = scalar_lea.vmem %s5356_s2, %s5163_s29  ;;  %s505_s4 = scalar_lea.vmem %s5357_s3, %s5163_s29 }
  0x71   : > { %v4398_v27 = vld [vmem:[#allocation2 + $0x3c] ss:$24 sps:$4 sm:$0xff]   ;;  %v514_v28 = vld [vmem:[%s493_s30] sm:$0xff]  ;;  %v4400_v31 = vld [vmem:[#allocation2 + $0x38] ss:$24 sps:$4 sm:$0xff]   ;;  %vm511_vm0 = vcmp.lt.s32.totalorder %v510_v2, 64 }
  0x72   : > { %939 = vmatpush1.bf16.msra.mxu0 %v4367_v10  ;;  %v4395_v29 = vld [vmem:[#allocation2 + $0x4] ss:$24 sps:$4 sm:$0xff]   ;;  %v4397_v30 = vld [vmem:[#allocation2] ss:$24 sps:$4 sm:$0xff]   ;;  %v5169_v32 = vmul.f32 11.313708, %v514_v28 }
  0x73   : > { %940 = vmatprep.subr.bf16.mxu0 %v4371_v11  ;;  %980 = vmatpush1.bf16.msra.mxu1 %v4376_v13  ;;  %v4404_v33 = vld [vmem:[#allocation2 + $0xc] ss:$24 sps:$4 sm:$0xff]   ;;  %v4406_v36 = vld [vmem:[#allocation2 + $0x8] ss:$24 sps:$4 sm:$0xff]   ;;  %v4981_v4 = vmov 1.0   ;;  %vm1147_vm1 = vcmask 64512  }
  0x74   : > { %981 = vmatprep.subr.bf16.mxu1 %v4380_v15  ;;  %v4403_v34 = vld [vmem:[#allocation2 + $0x164] ss:$24 sps:$4 sm:$0xff]   ;;  %v693_v35 = vpack.c.bf16 %v5169_v32, %v5169_v32  ;;  %v4401_v37 = vld [vmem:[#allocation2 + $0x160] ss:$24 sps:$4 sm:$0xff]   ;;  %v4409_v38 = vld [vmem:[#allocation2 + $0x134] ss:$24 sps:$4 sm:$0xff]  }
  0x75   : > { %v4407_v39 = vld [vmem:[#allocation2 + $0x130] ss:$24 sps:$4 sm:$0xff]   ;;  %v4412_v40 = vld [vmem:[#allocation2 + $0x104] ss:$24 sps:$4 sm:$0xff]   ;;  %v4410_v41 = vld [vmem:[#allocation2 + $0x100] ss:$24 sps:$4 sm:$0xff]  }
  0x76   : > { %941 = vmatpush1.bf16.msra.mxu0 %v4373_v14  ;;  %v4415_v42 = vld [vmem:[#allocation2 + $0xd4] ss:$24 sps:$4 sm:$0xff]   ;;  %v4413_v43 = vld [vmem:[#allocation2 + $0xd0] ss:$24 sps:$4 sm:$0xff]   ;;  %v4418_v44 = vld [vmem:[#allocation2 + $0xa4] ss:$24 sps:$4 sm:$0xff]  }
  0x77   : > { %942 = vmatprep.subr.bf16.mxu0 %v4377_v16  ;;  %982 = vmatpush1.bf16.msra.mxu1 %v4382_v17  ;;  %v4416_v45 = vld [vmem:[#allocation2 + $0xa0] ss:$24 sps:$4 sm:$0xff]   ;;  %v4421_v46 = vld [vmem:[#allocation2 + $0x74] ss:$24 sps:$4 sm:$0xff]   ;;  %v4419_v47 = vld [vmem:[#allocation2 + $0x70] ss:$24 sps:$4 sm:$0xff]  }
  0x78   : > { %983 = vmatprep.subr.bf16.mxu1 %v4386_v19  ;;  %v4424_v48 = vld [vmem:[#allocation2 + $0x44] ss:$24 sps:$4 sm:$0xff]   ;;  %v4422_v49 = vld [vmem:[#allocation2 + $0x40] ss:$24 sps:$4 sm:$0xff]   ;;  %v4427_v50 = vld [vmem:[#allocation2 + $0x14] ss:$24 sps:$4 sm:$0xff]  }
  0x79   : > { %v4425_v51 = vld [vmem:[#allocation2 + $0x10] ss:$24 sps:$4 sm:$0xff]   ;;  %v5180_v5 = vsel %vm511_vm0, -1.0, %v4981_v4  ;;  %v5192_v9 = vld [vmem:[%s497_s19] sm:$0xff]  ;;  %s487_s22 = sand.u32 1, %s4956_s18   ;;  %p5389_p8 = scmp.ne.s32.totalorder %s5376_s27, 0 }
  0x7a   : > { %943 = vmatpush1.bf16.msra.mxu0 %v4379_v18  ;;  %v5194_v10 = vld [vmem:[%s501_s15] sm:$0xff]  ;;  %s3787_s19 = sshll.u32 %s487_s22, 4  ;;  %s4078_s15 = sshll.u32 %s5064_s21, 8 }
  0x7b   : > { %944 = vmatprep.subr.bf16.mxu0 %v4383_v20  ;;  %984 = vmatpush1.bf16.msra.mxu1 %v4388_v21  ;;  %s489_s12 = scalar_lea.vmem [#allocation11], %s3787_s19  ;;  %s3614_s29 = scalar_lea.sflag [#allocation4], %s487_s22 }
  0x7c   : > { %985 = vmatprep.subr.bf16.mxu1 %v4392_v23  ;;  %s3628_s23 = sshll.u32 %s489_s12, 4  ;;  %s4982_s21 = smov [#allocation11]   ;;  %s5310_s23 = int_to_ptr.vmem [resolvable:$true] %s3628_s23 }
  0x7d   : > { %s4892_s13 = scalar_lea.vmem %s5310_s23, 256  ;;  %s4896_s24 = sshll.u32 %s4982_s21, 4  ;;  %s4897_s24 = int_to_ptr.vmem [resolvable:$false] %s4896_s24 }
  0x7e   : > { %945 = vmatpush1.bf16.msra.mxu0 %v4385_v22  ;;  %p4893_p7 = scmp.ne.s32.totalorder %s5310_s23, %s4892_s13  ;;  %s4898_s30 = scalar_lea.vmem %s4897_s24, 512 }
  0x7f   : > { %946 = vmatprep.subr.bf16.mxu0 %v4389_v24  ;;  %986 = vmatpush1.bf16.msra.mxu1 %v4394_v26  ;;  %p4899_p5 = scmp.lt.s32.totalorder %s5310_s23, %s4897_s24  ;;  %p4900_p6 = scmp.lt.s32.totalorder %s4898_s30, %s4892_s13 }
  0x80   : > { %987 = vmatprep.subr.bf16.mxu1 %v4398_v27  ;;  %p4894_p9 = pnand %p4893_p7, %p5389_p8 }
  0x81   : > { %p4901_p0 = por %p4900_p6, %p4899_p5 }
  0x82   : > { %947 = vmatpush1.bf16.msra.mxu0 %v4391_v25  ;;  %p4895_p11 = pneg %p4894_p9 }
  0x83   : > { %948 = vmatprep.subr.bf16.mxu0 %v4395_v29  ;;  %988 = vmatpush1.bf16.msra.mxu1 %v4400_v31 }
  0x84   : > { %989 = vmatprep.subr.bf16.mxu1 %v4404_v33  ;;  %p4902_p1 = pnand %p4901_p0, %p4895_p11 }
  0x86   : > { %949 = vmatpush1.bf16.msra.mxu0 %v4397_v30 }
  0x87   : > { %1016 = vmatprep.subr.bf16.mxu0 %v4403_v34  ;;  %990 = vmatpush1.bf16.msra.mxu1 %v4406_v36 }
  0x89   : > { %967 = vmatmul.mubr.bf16.vlgmr.msra.gmra.mxu0 %v693_v35 }
  0x8a   : > { %1017 = vmatpush1.bf16.msra.mxu0 %v4401_v37  ;;  %1048 = vmatprep.mubr.bf16.mxu0 %v4979_v0 }
  0x8b   : > { %1018 = vmatprep.subr.bf16.mxu0 %v4409_v38  ;;  %1008 = vmatmul.mubr.bf16.vlgmr.msra.gmra.mxu1 %v693_v35 }
  0x8e   : > { %1019 = vmatpush1.bf16.msra.mxu0 %v4407_v39  ;;  %v5213_v39 = vld [vmem:[%s505_s4] sm:$0xff]  ;;  %s5315_s4 = scalar_lea.hbm %s5365_s11, %s4078_s15 }
  0x8f   : > { %1020 = vmatprep.subr.bf16.mxu0 %v4412_v40 }
  0x92   : > { %1021 = vmatpush1.bf16.msra.mxu0 %v4410_v41 }
  0x93   : > { %1022 = vmatprep.subr.bf16.mxu0 %v4415_v42 }
  0x96   : > { %1023 = vmatpush1.bf16.msra.mxu0 %v4413_v43 }
  0x97   : > { %1024 = vmatprep.subr.bf16.mxu0 %v4418_v44 }
  0x9a   : > { %1025 = vmatpush1.bf16.msra.mxu0 %v4416_v45 }
  0x9b   : > { %1026 = vmatprep.subr.bf16.mxu0 %v4421_v46 }
  0x9e   : > { %1027 = vmatpush1.bf16.msra.mxu0 %v4419_v47 }
  0x9f   : > { %1028 = vmatprep.subr.bf16.mxu0 %v4424_v48 }
  0xa2   : > { %1029 = vmatpush1.bf16.msra.mxu0 %v4422_v49 }
  0xa3   : > { %1030 = vmatprep.subr.bf16.mxu0 %v4427_v50 }
  0xa6   : > { %1031 = vmatpush1.bf16.msra.mxu0 %v4425_v51 }
  0xa9   : > { %1049 = vmatmul.mubr.bf16.vlgmr.msra.gmra.mxu0 %v693_v35 }
 0x149   : > { %v968_v52 = vpop.f32.mrf.mxu0 }
 0x14a   : > { %v1057_v19 = vmul.f32 %v968_v52, %v5192_v9 }
 0x14b   : > { %v970_v53 = vpop.f32.mrf.mxu0  ;;  %v1009_v54 = vpop.f32.mrf.mxu1 }
 0x14c   : > { %1063 = vrot.lane.b32.xlu1 %v970_v53, %s4980_s25  ;;  %v1058_v20 = vmul.f32 %v970_v53, %v5192_v9  ;;  %v1059_v28 = vmul.f32 %v1009_v54, %v5192_v9 }
 0x14d   : > { %v972_v55 = vpop.f32.mrf.mxu0  ;;  %v1011_v56 = vpop.f32.mrf.mxu1 }
 0x14e   : > { %v1060_v29 = vmul.f32 %v1011_v56, %v5192_v9 }
 0x14f   : > { %v973_v57 = vpop.f32.mrf.mxu0  ;;  %v1013_v58 = vpop.f32.mrf.mxu1 }
 0x150   : > { %1065 = vrot.lane.b32.xlu1 %v1009_v54, %s4980_s25 }
 0x151   : > { %v1014_v59 = vpop.f32.mrf.mxu1 }
 0x169   : > { %v1050_v60 = vpop.f32.mrf.mxu0 }
 0x16a   : > { %1084 = vrot.lane.b32.xlu0 %v1050_v60, %s4980_s25  ;;  %v1083_v12 = vmul.f32 %v1050_v60, %v5192_v9 }
 0x16b   : > { %v1052_v61 = vpop.f32.mrf.mxu0 }
 0x16d   : > { %v1054_v62 = vpop.f32.mrf.mxu0 }
 0x16e   : > { %1061 = vrot.lane.b32.xlu0 %v968_v52, %s4980_s25 }
 0x16f   : > { %v1055_v63 = vpop.f32.mrf.mxu0 }
 0x172   : > { %1067 = vrot.lane.b32.xlu0 %v1011_v56, %s4980_s25 }
 0x1be   : > { %v1064_v3 = vpop.permute.xlu1 %1063 }
 0x1bf   : > { %v1070_v7 = vmul.f32 %v1064_v3, %v5180_v5 }
 0x1c1   : > { %v1074_v15 = vmul.f32 %v1070_v7, %v5194_v10 }
 0x1c2   : > { %v1066_v11 = vpop.permute.xlu1 %1065 }
 0x1c3   : > { %v1071_v16 = vmul.f32 %v1066_v11, %v5180_v5  ;;  %v1078_v24 = vadd.f32 %v1074_v15, %v1058_v20  ;;  %v4432_v15 = vld [vmem:[#allocation5 + $0xf8] sm:$0xff]   ;;  %v4441_v20 = vld [vmem:[#allocation5 + $0xa8] sm:$0xff]  }
 0x1c4   : > { %4109 = vmatprep.subr.bf16.mxu0 %v4432_v15 }
 0x1c5   : > { %v1075_v25 = vmul.f32 %v1071_v16, %v5194_v10  ;;  %v4433_v16 = vld [vmem:[#allocation5 + $0xb8] sm:$0xff]  }
 0x1c6   : > { %4110 = vmatpush3.bf16.msra.mxu0 %v4433_v16 }
 0x1c7   : > { %v1079_v33 = vadd.f32 %v1075_v25, %v1059_v28  ;;  %v4452_v25 = vld [vmem:[#allocation5 + $0xd0] sm:$0xff]  }
 0x1dc   : > { %v1085_v6 = vpop.permute.xlu0 %1084 }
 0x1dd   : > { %v1086_v8 = vmul.f32 %v1085_v6, %v5180_v5 }
 0x1df   : > { %v1087_v13 = vmul.f32 %v1086_v8, %v5194_v10 }
 0x1e0   : > { %v1062_v14 = vpop.permute.xlu0 %1061 }
 0x1e1   : > { %v1069_v17 = vmul.f32 %v1062_v14, %v5180_v5  ;;  %v1088_v18 = vadd.f32 %v1087_v13, %v1083_v12  ;;  %v4428_v14 = vld [vmem:[#allocation5 + $0x78] sm:$0xff]  }
 0x1e3   : > { %v1073_v21 = vmul.f32 %v1069_v17, %v5194_v10  ;;  %v1089_v22 = vpack.c.bf16 %v1088_v18, %v1088_v18  ;;  %v4436_v17 = vld [vmem:[#allocation5 + $0xf0] sm:$0xff]  }
 0x1e4   : > { %v1068_v23 = vpop.permute.xlu0 %1067  ;;  %v4437_v18 = vld [vmem:[#allocation5 + $0xb0] sm:$0xff]   ;;  %4111 = vmatprep.subr.bf16.mxu0 %v4436_v17 }
 0x1e5   : > { %v1077_v26 = vadd.f32 %v1073_v21, %v1057_v19  ;;  %v1072_v27 = vmul.f32 %v1068_v23, %v5180_v5  ;;  %4227 = vmatprep.subr.bf16.mxu1 %v1089_v22  ;;  %4112 = vmatpush3.bf16.msra.mxu0 %v4437_v18  ;;  %v4440_v19 = vld [vmem:[#allocation5 + $0xe8] sm:$0xff]   ;;  %v4444_v21 = vld [vmem:[#allocation5 + $0xe0] sm:$0xff]   ;;  %v4448_v23 = vld [vmem:[#allocation5 + $0xd8] sm:$0xff]  }
 0x1e6   : > { %4228 = vmatpush3.bf16.xpose.msra.mxu1 %v1089_v22  ;;  %4113 = vmatprep.subr.bf16.mxu0 %v4440_v19  ;;  %v4445_v22 = vld [vmem:[#allocation5 + $0xa0] sm:$0xff]  }
 0x1e7   : > { %v1076_v30 = vmul.f32 %v1072_v27, %v5194_v10  ;;  %4233 = vmatprep.subr.mxu1 %v1052_v61  ;;  %v1081_v31 = vpack.c.bf16 %v1078_v24, %v1077_v26  ;;  %v4449_v24 = vld [vmem:[#allocation5 + $0x98] sm:$0xff]   ;;  %v4453_v26 = vld [vmem:[#allocation5 + $0x90] sm:$0xff]  }
 0x1e9   : > { %v1080_v34 = vadd.f32 %v1076_v30, %v1060_v29  ;;  %4229 = vmatprep.mubr.bf16.mxu1 %v1081_v31  ;;  %4114 = vmatpush3.bf16.msra.mxu0 %v4441_v20 }
 0x1ea   : > { %4115 = vmatprep.subr.bf16.mxu0 %v4444_v21 }
 0x1eb   : > { %v1082_v35 = vpack.c.bf16 %v1080_v34, %v1079_v33 }
 0x1ed   : > { %4230 = vmatmul.mubr.bf16.vlgmr.msra.gmra.mxu1 %v1082_v35  ;;  %4116 = vmatpush3.bf16.msra.mxu0 %v4445_v22  ;;  %v4429_v35 = vld [vmem:[#allocation5 + $0x38] sm:$0xff]  }
 0x1ee   : > { %4234 = vmatpush3.msra.mxu1 %v1052_v61  ;;  %4117 = vmatprep.subr.bf16.mxu0 %v4448_v23 }
 0x1ef   : > { %4087 = vmatprep.subr.bf16.mxu1 %v4428_v14 }
 0x1f1   : > { %4118 = vmatpush3.bf16.msra.mxu0 %v4449_v24 }
 0x1f2   : > { %4119 = vmatprep.subr.bf16.mxu0 %v4452_v25  ;;  %v4468_v25 = vld [vmem:[#allocation7 + $0xc4] ss:$16 sps:$4 sm:$0xff]  }
 0x1f5   : > { %4120 = vmatpush3.bf16.msra.mxu0 %v4453_v26  ;;  %v4471_v26 = vld [vmem:[#allocation7 + $0xcc] ss:$16 sps:$4 sm:$0xff]  }
 0x2ad   : > { %v4231_v36 = vpop.f32.mrf.mxu1 }
 0x2ae   : > { %v1141_v44 = vmul.f32 0.088388346, %v4231_v36 }
 0x2af   : > { %v1124_v37 = vpop.f32.mrf.mxu1 }
 0x2b0   : > { %v1139_v38 = vmul.f32 0.088388346, %v1124_v37  ;;  %v1145_v51 = vadd.f32 %v1141_v44, %v5213_v39  ;;  %v4430_v37 = vld [vmem:[#allocation5 + $0x70] sm:$0xff]   ;;  %v4434_v44 = vld [vmem:[#allocation5 + $0x68] sm:$0xff]  }
 0x2b1   : > { %v4232_v40 = vpop.f32.mrf.mxu1 }
 0x2b2   : > { %v1142_v41 = vmul.f32 0.088388346, %v4232_v40  ;;  %v1143_v42 = vadd.f32 %v1139_v38, %v5213_v39  ;;  %v1154_v52 = vsel %vm1147_vm1, %v1145_v51, -inf }
 0x2b3   : > { %v1127_v43 = vpop.f32.mrf.mxu1 }
 0x2b4   : > { %v1140_v45 = vmul.f32 0.088388346, %v1127_v43  ;;  %v1148_v46 = vsel %vm1147_vm1, %v1143_v42, -inf  ;;  %v1146_v47 = vadd.f32 %v1142_v41, %v5213_v39 }
 0x2b5   : > { %1149 = vmax.xlane.f32.xlu1 %v1148_v46  ;;  %v4438_v46 = vld [vmem:[#allocation5 + $0x60] sm:$0xff]  }
 0x2b6   : > { %v1144_v48 = vadd.f32 %v1140_v45, %v5213_v39  ;;  %v1157_v49 = vsel %vm1147_vm1, %v1146_v47, -inf  ;;  %v4435_v45 = vld [vmem:[#allocation5 + $0x28] sm:$0xff]  }
 0x2b8   : > { %v1151_v50 = vsel %vm1147_vm1, %v1144_v48, -inf }
 0x2b9   : > { %1158 = vmax.xlane.f32.xlu1 %v1157_v49  ;;  %1152 = vmax.xlane.f32.xlu0 %v1151_v50  ;;  %v4443_v49 = vld [vmem:[#allocation5 + $0x18] sm:$0xff]   ;;  %v4446_v50 = vld [vmem:[#allocation5 + $0x50] sm:$0xff]  }
 0x2bd   : > { %1155 = vmax.xlane.f32.xlu0 %v1154_v52  ;;  %v4450_v52 = vld [vmem:[#allocation5 + $0x48] sm:$0xff]  }
 0x33e   : > { %v1150_v53 = vpop.xlane.xlu1 %1149 }
 0x33f   : > { %v1160_v54 = vsub.f32 %v1143_v42, %v1150_v53  ;;  %v4431_v42 = vld [vmem:[#allocation5 + $0x30] sm:$0xff]   ;;  %v4451_v53 = vld [vmem:[#allocation5 + $0x8] sm:$0xff]  }
 0x341   : > { %v1164_v55 = vmul.f32 1.442695, %v1160_v54  ;;  %v4454_v54 = vld [vmem:[#allocation5 + $0x40] sm:$0xff]  }
 0x342   : > { %v1159_v56 = vpop.xlane.xlu1 %1158  ;;  %v1153_v57 = vpop.xlane.xlu0 %1152 }
 0x343   : > { %4716 = vpow2.f32 %v1164_v55  ;;  %v1163_v58 = vsub.f32 %v1146_v47, %v1159_v56  ;;  %v1161_v59 = vsub.f32 %v1144_v48, %v1153_v57  ;;  %v4439_v47 = vld [vmem:[#allocation5 + $0x20] sm:$0xff]   ;;  %v4442_v48 = vld [vmem:[#allocation5 + $0x58] sm:$0xff]   ;;  %v4456_v56 = vld [vmem:[#allocation5 + $0xc8] sm:$0xff]  }
 0x344   : > { %v4455_v55 = vld [vmem:[#allocation5] sm:$0xff]   ;;  %v4457_v57 = vld [vmem:[#allocation5 + $0x88] sm:$0xff]   ;;  %4121 = vmatprep.subr.bf16.mxu0 %v4456_v56 }
 0x345   : > { %v1166_v60 = vmul.f32 1.442695, %v1161_v59  ;;  %v1170_v61 = vmul.f32 1.442695, %v1163_v58  ;;  %4122 = vmatpush3.bf16.msra.mxu0 %v4457_v57  ;;  %v4458_v58 = vld [vmem:[#allocation5 + $0xc0] sm:$0xff]  }
 0x346   : > { %v1156_v62 = vpop.xlane.xlu0 %1155  ;;  %v4459_v59 = vld [vmem:[#allocation5 + $0x80] sm:$0xff]   ;;  %4123 = vmatprep.subr.bf16.mxu0 %v4458_v58 }
 0x347   : > { %v1162_v63 = vsub.f32 %v1145_v51, %v1156_v62  ;;  %4718 = vpow2.f32 %v1166_v60  ;;  %v4447_v51 = vld [vmem:[#allocation5 + $0x10] sm:$0xff]  }
 0x348   : > { %4720 = vpow2.f32 %v1170_v61 }
 0x349   : > { %v1168_v2 = vmul.f32 1.442695, %v1162_v63  ;;  %4124 = vmatpush3.bf16.msra.mxu0 %v4459_v59  ;;  %v1583_v59 = vshrl.u32 %v509_v1, 7  ;;  %v4509_v1 = vld [vmem:[#allocation8 + $0x38] sm:$0xff]  }
 0x34b   : > { %4722 = vpow2.f32 %v1168_v2 }
 0x350   : > { %v4717_v3 = vpop.eup %4716 }
 0x351   : > { %v1172_v4 = vsel %vm1147_vm1, %v4717_v3, 0.0 }
 0x352   : > { %1173 = vadd.xlane.f32.xlu0 %v1172_v4 }
 0x354   : > { %v4719_v6 = vpop.eup %4718 }
 0x355   : > { %v1175_v7 = vsel %vm1147_vm1, %v4719_v6, 0.0  ;;  %v4721_v8 = vpop.eup %4720 }
 0x356   : > { %1176 = vadd.xlane.f32.xlu1 %v1175_v7  ;;  %v1181_v13 = vsel %vm1147_vm1, %v4721_v8, 0.0  ;;  %v4460_v7 = vld [vmem:[#allocation7 + $0xe0] ss:$16 sps:$4 sm:$0xff]  }
 0x358   : > { %v4723_v11 = vpop.eup %4722 }
 0x359   : > { %v1178_v12 = vsel %vm1147_vm1, %v4723_v11, 0.0 }
 0x35a   : > { %1179 = vadd.xlane.f32.xlu0 %v1178_v12  ;;  %1182 = vadd.xlane.f32.xlu1 %v1181_v13  ;;  %v4465_v12 = vld [vmem:[#allocation7 + $0xec] ss:$16 sps:$4 sm:$0xff]  }
 0x35b   : > { %1790 = vmatprep.subr.bf16.mxu0 %v4465_v12 }
 0x3db   : > { %v1174_v27 = vpop.xlane.xlu0 %1173 }
 0x3dc   : > { %4724 = vrcp.f32 %v1174_v27  ;;  %v4466_v27 = vld [vmem:[#allocation7 + $0xc0] ss:$16 sps:$4 sm:$0xff]  }
 0x3df   : > { %v1177_v28 = vpop.xlane.xlu1 %1176 }
 0x3e0   : > { %4726 = vrcp.f32 %v1177_v28  ;;  %v4469_v28 = vld [vmem:[#allocation7 + $0xc8] ss:$16 sps:$4 sm:$0xff]  }
 0x3e3   : > { %v1180_v29 = vpop.xlane.xlu0 %1179  ;;  %v1183_v30 = vpop.xlane.xlu1 %1182 }
 0x3e4   : > { %4728 = vrcp.f32 %v1180_v29  ;;  %v4474_v29 = vld [vmem:[#allocation7 + $0xa4] ss:$16 sps:$4 sm:$0xff]  }
 0x3e5   : > { %4730 = vrcp.f32 %v1183_v30  ;;  %v4477_v30 = vld [vmem:[#allocation7 + $0xac] ss:$16 sps:$4 sm:$0xff]  }
 0x3e9   : > { %v4725_v31 = vpop.eup %4724 }
 0x3ea   : > { %v1188_v33 = vmul.f32 %v4725_v31, %v4717_v3  ;;  %v4472_v31 = vld [vmem:[#allocation7 + $0xa0] ss:$16 sps:$4 sm:$0xff]  }
 0x3ec   : > { %4235 = vmatprep.mubr.msk.f32.mxu1 %vm1147_vm1, %v1188_v33  ;;  %v4475_v33 = vld [vmem:[#allocation7 + $0xa8] ss:$16 sps:$4 sm:$0xff]  }
 0x3ed   : > { %v4727_v34 = vpop.eup %4726 }
 0x3ee   : > { %v1189_v36 = vmul.f32 %v4727_v34, %v4719_v6  ;;  %v4480_v34 = vld [vmem:[#allocation7 + $0x84] ss:$16 sps:$4 sm:$0xff]  }
 0x3f0   : > { %4236 = vmatmul.mubr.msk.f32.vlgmr.msra.gmra.mxu1 %vm1147_vm1, %v1189_v36  ;;  %v4478_v36 = vld [vmem:[#allocation7 + $0x80] ss:$16 sps:$4 sm:$0xff]  }
 0x3f1   : > { %v4729_v38 = vpop.eup %4728  ;;  %4088 = vmatpush3.bf16.msra.mxu1 %v4429_v35  ;;  %v4483_v35 = vld [vmem:[#allocation7 + $0x8c] ss:$16 sps:$4 sm:$0xff]  }
 0x3f2   : > { %v4731_v40 = vpop.eup %4730  ;;  %v1190_v41 = vmul.f32 %v4729_v38, %v4723_v11  ;;  %4089 = vmatprep.subr.bf16.mxu1 %v4430_v37  ;;  %v4463_v11 = vld [vmem:[#allocation7 + $0xe8] ss:$16 sps:$4 sm:$0xff]   ;;  %v4486_v38 = vld [vmem:[#allocation7 + $0x64] ss:$16 sps:$4 sm:$0xff]  }
 0x3f3   : > { %v1191_v43 = vmul.f32 %v4731_v40, %v4721_v8  ;;  %v4462_v8 = vld [vmem:[#allocation7 + $0xe4] ss:$16 sps:$4 sm:$0xff]   ;;  %v4481_v37 = vld [vmem:[#allocation7 + $0x88] ss:$16 sps:$4 sm:$0xff]   ;;  %v4489_v40 = vld [vmem:[#allocation7 + $0x6c] ss:$16 sps:$4 sm:$0xff]  }
 0x3f4   : > { %4238 = vmatprep.mubr.msk.f32.mxu1 %vm1147_vm1, %v1190_v41  ;;  %v4484_v41 = vld [vmem:[#allocation7 + $0x60] ss:$16 sps:$4 sm:$0xff]  }
 0x3f5   : > { %4239 = vmatmul.mubr.msk.f32.gmra.mxu1 %vm1147_vm1, %v1191_v43  ;;  %v4492_v43 = vld [vmem:[#allocation7 + $0x44] ss:$16 sps:$4 sm:$0xff]  }
 0x3f6   : > { %4090 = vmatpush3.bf16.msra.mxu1 %v4431_v42  ;;  %v4487_v42 = vld [vmem:[#allocation7 + $0x68] ss:$16 sps:$4 sm:$0xff]  }
 0x3f7   : > { %4091 = vmatprep.subr.bf16.mxu1 %v4434_v44  ;;  %v4495_v44 = vld [vmem:[#allocation7 + $0x4c] ss:$16 sps:$4 sm:$0xff]  }
 0x3fa   : > { %4092 = vmatpush3.bf16.msra.mxu1 %v4435_v45  ;;  %v4490_v45 = vld [vmem:[#allocation7 + $0x40] ss:$16 sps:$4 sm:$0xff]  }
 0x3fb   : > { %4093 = vmatprep.subr.bf16.mxu1 %v4438_v46  ;;  %v4493_v46 = vld [vmem:[#allocation7 + $0x48] ss:$16 sps:$4 sm:$0xff]  }
 0x3fe   : > { %4094 = vmatpush3.bf16.msra.mxu1 %v4439_v47  ;;  %v4498_v47 = vld [vmem:[#allocation7 + $0x24] ss:$16 sps:$4 sm:$0xff]  }
 0x3ff   : > { %4095 = vmatprep.subr.bf16.mxu1 %v4442_v48  ;;  %v4501_v48 = vld [vmem:[#allocation7 + $0x2c] ss:$16 sps:$4 sm:$0xff]  }
 0x402   : > { %4096 = vmatpush3.bf16.msra.mxu1 %v4443_v49  ;;  %v4496_v49 = vld [vmem:[#allocation7 + $0x20] ss:$16 sps:$4 sm:$0xff]  }
 0x403   : > { %4097 = vmatprep.subr.bf16.mxu1 %v4446_v50  ;;  %v4499_v50 = vld [vmem:[#allocation7 + $0x28] ss:$16 sps:$4 sm:$0xff]  }
 0x406   : > { %4098 = vmatpush3.bf16.msra.mxu1 %v4447_v51  ;;  %v4504_v51 = vld [vmem:[#allocation7 + $0x4] ss:$16 sps:$4 sm:$0xff]  }
 0x407   : > { %4099 = vmatprep.subr.bf16.mxu1 %v4450_v52  ;;  %v4507_v52 = vld [vmem:[#allocation7 + $0xc] ss:$16 sps:$4 sm:$0xff]  }
 0x40a   : > { %4100 = vmatpush3.bf16.msra.mxu1 %v4451_v53  ;;  %v4502_v53 = vld [vmem:[#allocation7] ss:$16 sps:$4 sm:$0xff]  }
 0x40b   : > { %4101 = vmatprep.subr.bf16.mxu1 %v4454_v54  ;;  %v4505_v54 = vld [vmem:[#allocation7 + $0x8] ss:$16 sps:$4 sm:$0xff]  }
 0x40e   : > { %4102 = vmatpush3.bf16.msra.mxu1 %v4455_v55  ;;  %v4508_v55 = vld [vmem:[#allocation8 + $0x78] sm:$0xff]  }
 0x40f   : > { %1749 = vmatprep.subr.bf16.mxu1 %v4462_v8 }
 0x4b0   : > { %v4237_v60 = vpop.f32.mrf.mxu1 }
 0x4b1   : > { %v1290_v61 = vpack.c.bf16 %v4237_v60, %v4237_v60  ;;  %v692_v60 = vld [vmem:[%s5360_s6] sm:$0x1] }
 0x4b2   : > { %v1270_v62 = vpop.f32.mrf.mxu1 }
 0x4b3   : > { %v1289_v63 = vpack.c.bf16 %v1270_v62, %v1270_v62  ;;  %1517 = vmatprep.mubr.bf16.mxu1 %v1290_v61  ;;  %v1580_v61 = vadd.f32 1.0, %v692_v60  ;;  %v5241_v62 = vsub.s32 0, %v1583_v59 }
 0x4b5   : > { %v4240_v2 = vpop.f32.mrf.mxu1  ;;  %1518 = vmatmul.mubr.bf16.vlgmr.msra.gmra.mxu1 %v1289_v63 }
 0x4b6   : > { %v1292_v3 = vpack.c.bf16 %v4240_v2, %v4240_v2  ;;  %1781 = vmatprep.mubr.bf16.mxu1 %v4979_v0  ;;  %1750 = vmatpush1.bf16.msra.mxu1 %v4460_v7 }
 0x4b7   : > { %v1280_v4 = vpop.f32.mrf.mxu1  ;;  %1751 = vmatprep.subr.bf16.mxu1 %v4468_v25  ;;  %v4521_v25 = vld [vmem:[#allocation8 + $0x8] sm:$0xff]  }
 0x4b8   : > { %v1291_v6 = vpack.c.bf16 %v1280_v4, %v1280_v4  ;;  %1557 = vmatprep.mubr.bf16.mxu0 %v1292_v3 }
 0x4ba   : > { %1558 = vmatmul.mubr.bf16.vlgmr.msra.gmra.mxu0 %v1291_v6  ;;  %1752 = vmatpush1.bf16.msra.mxu1 %v4466_v27  ;;  %v1585_v6 = vrot.slane %v1580_v61, %v5241_v62  ;;  %v4523_v27 = vld [vmem:[#allocation8] sm:$0xff]  }
 0x4bb   : > { %1822 = vmatprep.mubr.bf16.mxu0 %v4979_v0  ;;  %1791 = vmatpush1.bf16.msra.mxu0 %v4463_v11 }
 0x4bc   : > { %1792 = vmatprep.subr.bf16.mxu0 %v4471_v26  ;;  %1753 = vmatprep.subr.bf16.mxu1 %v4474_v29  ;;  %v4522_v26 = vld [vmem:[#allocation8 + $0x40] sm:$0xff]   ;;  %v4526_v29 = vld [vmem:[#allocation2 + $0x2d4] ss:$24 sps:$4 sm:$0xff]  }
 0x4be   : > { %1754 = vmatpush1.bf16.msra.mxu1 %v4472_v31  ;;  %v4532_v31 = vld [vmem:[#allocation2 + $0x2a4] ss:$24 sps:$4 sm:$0xff]  }
 0x4bf   : > { %1793 = vmatpush1.bf16.msra.mxu0 %v4469_v28  ;;  %1755 = vmatprep.subr.bf16.mxu1 %v4480_v34  ;;  %v4524_v28 = vld [vmem:[#allocation2 + $0x2d0] ss:$24 sps:$4 sm:$0xff]   ;;  %v4538_v34 = vld [vmem:[#allocation2 + $0x274] ss:$24 sps:$4 sm:$0xff]  }
 0x4c0   : > { %1794 = vmatprep.subr.bf16.mxu0 %v4477_v30  ;;  %v4529_v30 = vld [vmem:[#allocation2 + $0x2dc] ss:$24 sps:$4 sm:$0xff]  }
 0x4c2   : > { %1756 = vmatpush1.bf16.msra.mxu1 %v4478_v36  ;;  %v4544_v36 = vld [vmem:[#allocation2 + $0x244] ss:$24 sps:$4 sm:$0xff]  }
 0x4c3   : > { %1795 = vmatpush1.bf16.msra.mxu0 %v4475_v33  ;;  %1757 = vmatprep.subr.bf16.mxu1 %v4486_v38  ;;  %v4530_v33 = vld [vmem:[#allocation2 + $0x2a0] ss:$24 sps:$4 sm:$0xff]   ;;  %v4550_v38 = vld [vmem:[#allocation2 + $0x214] ss:$24 sps:$4 sm:$0xff]  }
 0x4c4   : > { %1796 = vmatprep.subr.bf16.mxu0 %v4483_v35  ;;  %v4536_v35 = vld [vmem:[#allocation2 + $0x270] ss:$24 sps:$4 sm:$0xff]  }
 0x4c6   : > { %1758 = vmatpush1.bf16.msra.mxu1 %v4484_v41  ;;  %v4556_v41 = vld [vmem:[#allocation2 + $0x1e4] ss:$24 sps:$4 sm:$0xff]  }
 0x4c7   : > { %1797 = vmatpush1.bf16.msra.mxu0 %v4481_v37  ;;  %1759 = vmatprep.subr.bf16.mxu1 %v4492_v43  ;;  %v4542_v37 = vld [vmem:[#allocation2 + $0x240] ss:$24 sps:$4 sm:$0xff]  }
 0x4c8   : > { %1798 = vmatprep.subr.bf16.mxu0 %v4489_v40  ;;  %v4548_v40 = vld [vmem:[#allocation2 + $0x210] ss:$24 sps:$4 sm:$0xff]  }
 0x4ca   : > { %1760 = vmatpush1.bf16.msra.mxu1 %v4490_v45 }
 0x4cb   : > { %1799 = vmatpush1.bf16.msra.mxu0 %v4487_v42  ;;  %1761 = vmatprep.subr.bf16.mxu1 %v4498_v47  ;;  %v4554_v42 = vld [vmem:[#allocation2 + $0x1e0] ss:$24 sps:$4 sm:$0xff]  }
 0x4cc   : > { %1800 = vmatprep.subr.bf16.mxu0 %v4495_v44 }
 0x4ce   : > { %1762 = vmatpush1.bf16.msra.mxu1 %v4496_v49 }
 0x4cf   : > { %1801 = vmatpush1.bf16.msra.mxu0 %v4493_v46  ;;  %1763 = vmatprep.subr.bf16.mxu1 %v4504_v51 }
 0x4d0   : > { %1802 = vmatprep.subr.bf16.mxu0 %v4501_v48 }
 0x4d2   : > { %1764 = vmatpush1.bf16.msra.mxu1 %v4502_v53 }
 0x4d3   : > { %1803 = vmatpush1.bf16.msra.mxu0 %v4499_v50  ;;  %4131 = vmatprep.subr.bf16.mxu1 %v4508_v55 }
 0x4d4   : > { %1804 = vmatprep.subr.bf16.mxu0 %v4507_v52 }
 0x4d7   : > { %1805 = vmatpush1.bf16.msra.mxu0 %v4505_v54 }
 0x4d8   : > { %2405 = vmatprep.subr.bf16.mxu0 %v4526_v29 }
 0x575   : > { %v4103_v13 = vpop.f32.mrf.mxu1 }
 0x577   : > { %v4104_v14 = vpop.f32.mrf.mxu1 }
 0x578   : > { %v4105_v19 = vadd.f32 %v4104_v14, %v4103_v13  ;;  %v4510_v13 = vld [vmem:[#allocation8 + $0x70] sm:$0xff]  }
 0x579   : > { %v4106_v15 = vpop.f32.mrf.mxu1  ;;  %v4511_v14 = vld [vmem:[#allocation8 + $0x30] sm:$0xff]  }
 0x57a   : > { %v4125_v16 = vpop.f32.mrf.mxu0  ;;  %v4512_v15 = vld [vmem:[#allocation8 + $0x68] sm:$0xff]  }
 0x57b   : > { %v4107_v17 = vpop.f32.mrf.mxu1 }
 0x57c   : > { %v4126_v18 = vpop.f32.mrf.mxu0  ;;  %v4514_v17 = vld [vmem:[#allocation8 + $0x60] sm:$0xff]  }
 0x57d   : > { %v4127_v20 = vadd.f32 %v4126_v18, %v4125_v16  ;;  %v4513_v16 = vld [vmem:[#allocation8 + $0x28] sm:$0xff]   ;;  %v4515_v18 = vld [vmem:[#allocation8 + $0x20] sm:$0xff]  }
 0x57e   : > { %v4128_v21 = vpop.f32.mrf.mxu0 }
 0x57f   : > { %v5233_v22 = vadd.f32 %v4127_v20, %v4105_v19  ;;  %v4516_v19 = vld [vmem:[#allocation8 + $0x58] sm:$0xff]   ;;  %v4518_v21 = vld [vmem:[#allocation8 + $0x50] sm:$0xff]  }
 0x580   : > { %v4129_v23 = vpop.f32.mrf.mxu0  ;;  %v4517_v20 = vld [vmem:[#allocation8 + $0x18] sm:$0xff]  }
 0x581   : > { %v1566_v24 = vmul.f32 %v5233_v22, %v5233_v22  ;;  %v4519_v23 = vld [vmem:[#allocation8 + $0x10] sm:$0xff]   ;;  %v1565_v29 = vadd.f32 %v5233_v22, %v5169_v32  ;;  %v4578_v32 = vld [vmem:[#allocation2 + $0x280] ss:$24 sps:$4 sm:$0xff]  }
 0x583   : > { %1567 = vadd.xlane.f32.xlu0 %v1566_v24  ;;  %v4520_v24 = vld [vmem:[#allocation8 + $0x48] sm:$0xff]  }
 0x60c   : > { %v1568_v56 = vpop.xlane.xlu0 %1567 }
 0x60d   : > { %v1570_v57 = vmul.f32 0.0078125, %v1568_v56 }
 0x60f   : > { %v1571_v58 = vadd.f32 1e-06, %v1570_v57 }
 0x611   : > { %4732 = vrsqrt.f32 %v1571_v58  ;;  %vm1574_vm2 = vcmp.eq.f32.partialorder %v1571_v58, inf  ;;  %v1577_v3 = vand.u32 2147483648, %v1571_v58  ;;  %vm1576_vm3 = vcmp.eq.f32.partialorder %v1571_v58, 0.0 }
 0x61e   : > { %v4733_v63 = vpop.eup %4732 }
 0x61f   : > { %v1573_v2 = vmul.f32 %v4733_v63, %v1571_v58 }
 0x621   : > { %v1575_v4 = vsel %vm1574_vm2, %v1571_v58, %v1573_v2 }
 0x622   : > { %v1578_v7 = vsel %vm1576_vm3, %v1577_v3, %v1575_v4  ;;  %v4527_v3 = vld [vmem:[#allocation2 + $0x2d8] ss:$24 sps:$4 sm:$0xff]  }
 0x623   : > { %v1579_v8 = vmul.f32 %v1578_v7, %v5233_v22  ;;  %v4533_v7 = vld [vmem:[#allocation2 + $0x2a8] ss:$24 sps:$4 sm:$0xff]   ;;  %v4583_v22 = vld [vmem:[#allocation2 + $0x254] ss:$24 sps:$4 sm:$0xff]  }
 0x625   : > { %v1587_v11 = vmul.f32 %v1585_v6, %v1579_v8  ;;  %v4535_v6 = vld [vmem:[#allocation2 + $0x2ac] ss:$24 sps:$4 sm:$0xff]   ;;  %v4541_v8 = vld [vmem:[#allocation2 + $0x27c] ss:$24 sps:$4 sm:$0xff]  }
 0x627   : > { %v1588_v12 = vpack.c.bf16 %v1587_v11, %v1587_v11  ;;  %v4539_v11 = vld [vmem:[#allocation2 + $0x278] ss:$24 sps:$4 sm:$0xff]  }
 0x629   : > { %1782 = vmatmul.mubr.bf16.vlgmr.msra.gmra.mxu1 %v1588_v12  ;;  %1823 = vmatmul.mubr.bf16.vlgmr.msra.gmra.mxu0 %v1588_v12  ;;  %v4545_v12 = vld [vmem:[#allocation2 + $0x248] ss:$24 sps:$4 sm:$0xff]  }
 0x62a   : > { %4132 = vmatpush3.bf16.msra.mxu1 %v4509_v1  ;;  %2437 = vmatprep.mubr.bf16.mxu0 %v4979_v0  ;;  %v4547_v1 = vld [vmem:[#allocation2 + $0x24c] ss:$24 sps:$4 sm:$0xff]  }
 0x62b   : > { %4133 = vmatprep.subr.bf16.mxu1 %v4510_v13  ;;  %2406 = vmatpush1.bf16.msra.mxu0 %v4524_v28  ;;  %v4553_v13 = vld [vmem:[#allocation2 + $0x21c] ss:$24 sps:$4 sm:$0xff]  }
 0x62c   : > { %2407 = vmatprep.subr.bf16.mxu0 %v4532_v31 }
 0x62e   : > { %4134 = vmatpush3.bf16.msra.mxu1 %v4511_v14  ;;  %v4551_v14 = vld [vmem:[#allocation2 + $0x218] ss:$24 sps:$4 sm:$0xff]  }
 0x62f   : > { %4135 = vmatprep.subr.bf16.mxu1 %v4512_v15  ;;  %2408 = vmatpush1.bf16.msra.mxu0 %v4530_v33  ;;  %v4559_v15 = vld [vmem:[#allocation2 + $0x1ec] ss:$24 sps:$4 sm:$0xff]  }
 0x630   : > { %2409 = vmatprep.subr.bf16.mxu0 %v4538_v34 }
 0x632   : > { %4136 = vmatpush3.bf16.msra.mxu1 %v4513_v16  ;;  %v4557_v16 = vld [vmem:[#allocation2 + $0x1e8] ss:$24 sps:$4 sm:$0xff]  }
 0x633   : > { %4137 = vmatprep.subr.bf16.mxu1 %v4514_v17  ;;  %2410 = vmatpush1.bf16.msra.mxu0 %v4536_v35  ;;  %v4562_v17 = vld [vmem:[#allocation2 + $0x1b4] ss:$24 sps:$4 sm:$0xff]   ;;  %v4572_v35 = vld [vmem:[#allocation2 + $0x2e0] ss:$24 sps:$4 sm:$0xff]  }
 0x634   : > { %2411 = vmatprep.subr.bf16.mxu0 %v4544_v36 }
 0x636   : > { %4138 = vmatpush3.bf16.msra.mxu1 %v4515_v18  ;;  %v4560_v18 = vld [vmem:[#allocation2 + $0x1b0] ss:$24 sps:$4 sm:$0xff]  }
 0x637   : > { %4139 = vmatprep.subr.bf16.mxu1 %v4516_v19  ;;  %2412 = vmatpush1.bf16.msra.mxu0 %v4542_v37  ;;  %v4563_v19 = vld [vmem:[#allocation2 + $0x1b8] ss:$24 sps:$4 sm:$0xff]   ;;  %v4577_v37 = vld [vmem:[#allocation2 + $0x2b4] ss:$24 sps:$4 sm:$0xff]  }
 0x638   : > { %2413 = vmatprep.subr.bf16.mxu0 %v4550_v38  ;;  %v4575_v38 = vld [vmem:[#allocation2 + $0x2b0] ss:$24 sps:$4 sm:$0xff]  }
 0x63a   : > { %4140 = vmatpush3.bf16.msra.mxu1 %v4517_v20  ;;  %v4565_v20 = vld [vmem:[#allocation2 + $0x1bc] ss:$24 sps:$4 sm:$0xff]  }
 0x63b   : > { %4141 = vmatprep.subr.bf16.mxu1 %v4518_v21  ;;  %2414 = vmatpush1.bf16.msra.mxu0 %v4548_v40  ;;  %v4568_v21 = vld [vmem:[#allocation2 + $0x184] ss:$24 sps:$4 sm:$0xff]  }
 0x63c   : > { %2415 = vmatprep.subr.bf16.mxu0 %v4556_v41  ;;  %v4580_v40 = vld [vmem:[#allocation2 + $0x284] ss:$24 sps:$4 sm:$0xff]   ;;  %v4581_v41 = vld [vmem:[#allocation2 + $0x250] ss:$24 sps:$4 sm:$0xff]  }
 0x63e   : > { %4142 = vmatpush3.bf16.msra.mxu1 %v4519_v23  ;;  %v4566_v23 = vld [vmem:[#allocation2 + $0x180] ss:$24 sps:$4 sm:$0xff]  }
 0x63f   : > { %4143 = vmatprep.subr.bf16.mxu1 %v4520_v24  ;;  %2416 = vmatpush1.bf16.msra.mxu0 %v4554_v42  ;;  %v4571_v24 = vld [vmem:[#allocation2 + $0x18c] ss:$24 sps:$4 sm:$0xff]  }
 0x640   : > { %2417 = vmatprep.subr.bf16.mxu0 %v4562_v17  ;;  %v4586_v42 = vld [vmem:[#allocation2 + $0x224] ss:$24 sps:$4 sm:$0xff]  }
 0x642   : > { %4144 = vmatpush3.bf16.msra.mxu1 %v4521_v25  ;;  %v4569_v25 = vld [vmem:[#allocation2 + $0x188] ss:$24 sps:$4 sm:$0xff]  }
 0x643   : > { %4145 = vmatprep.subr.bf16.mxu1 %v4522_v26  ;;  %2418 = vmatpush1.bf16.msra.mxu0 %v4560_v18  ;;  %v4574_v26 = vld [vmem:[#allocation2 + $0x2e4] ss:$24 sps:$4 sm:$0xff]  }
 0x644   : > { %2419 = vmatprep.subr.bf16.mxu0 %v4568_v21 }
 0x646   : > { %4146 = vmatpush3.bf16.msra.mxu1 %v4523_v27 }
 0x647   : > { %2446 = vmatprep.subr.bf16.mxu1 %v4529_v30  ;;  %2420 = vmatpush1.bf16.msra.mxu0 %v4566_v23 }
 0x648   : > { %2487 = vmatprep.subr.bf16.mxu0 %v4574_v26 }
 0x6e9   : > { %v1783_v43 = vpop.f32.mrf.mxu1  ;;  %v1824_v44 = vpop.f32.mrf.mxu0 }
 0x6ea   : > { %v1833_v45 = vmul.f32 0.70710677, %v1783_v43  ;;  %v1831_v54 = vmul.f32 0.5, %v1783_v43  ;;  %v4584_v43 = vld [vmem:[#allocation2 + $0x220] ss:$24 sps:$4 sm:$0xff]  }
 0x6eb   : > { %v1785_v46 = vpop.f32.mrf.mxu1  ;;  %v1826_v47 = vpop.f32.mrf.mxu0 }
 0x6ec   : > { %4734 = verf.f32 %v1833_v45  ;;  %v1834_v48 = vmul.f32 0.70710677, %v1785_v46  ;;  %v1832_v58 = vmul.f32 0.5, %v1785_v46  ;;  %v4587_v45 = vld [vmem:[#allocation2 + $0x1f0] ss:$24 sps:$4 sm:$0xff]  }
 0x6ed   : > { %v1787_v49 = vpop.f32.mrf.mxu1  ;;  %v1828_v50 = vpop.f32.mrf.mxu0  ;;  %v4592_v46 = vld [vmem:[#allocation2 + $0x1c4] ss:$24 sps:$4 sm:$0xff]  }
 0x6ee   : > { %4736 = verf.f32 %v1834_v48  ;;  %v4595_v48 = vld [vmem:[#allocation2 + $0x194] ss:$24 sps:$4 sm:$0xff]   ;;  %v4593_v49 = vld [vmem:[#allocation2 + $0x190] ss:$24 sps:$4 sm:$0xff]  }
 0x6ef   : > { %v1788_v51 = vpop.f32.mrf.mxu1  ;;  %v1829_v52 = vpop.f32.mrf.mxu0 }
 0x6f9   : > { %v4735_v53 = vpop.eup %4734 }
 0x6fa   : > { %v1837_v55 = vadd.f32 1.0, %v4735_v53 }
 0x6fb   : > { %v4737_v56 = vpop.eup %4736 }
 0x6fc   : > { %v1839_v57 = vmul.f32 %v1837_v55, %v1831_v54  ;;  %v1838_v59 = vadd.f32 1.0, %v4737_v56 }
 0x6fe   : > { %v1840_v60 = vmul.f32 %v1838_v59, %v1832_v58  ;;  %v1841_v61 = vmul.f32 %v1839_v57, %v1824_v44  ;;  %v4589_v44 = vld [vmem:[#allocation2 + $0x1f4] ss:$24 sps:$4 sm:$0xff]  }
 0x700   : > { %v1842_v63 = vmul.f32 %v1840_v60, %v1826_v47  ;;  %v1843_v4 = vpack.c.bf16 %v1841_v61, %v1841_v61  ;;  %v4590_v47 = vld [vmem:[#allocation2 + $0x1c0] ss:$24 sps:$4 sm:$0xff]  }
 0x702   : > { %v1844_v2 = vpack.c.bf16 %v1842_v63, %v1842_v63 }
 0x704   : > { %1973 = vmatprep.mubr.bf16.mxu1 %v1844_v2 }
 0x705   : > { %1974 = vmatmul.mubr.bf16.vlgmr.msra.gmra.mxu1 %v1843_v4 }
 0x706   : > { %2447 = vmatpush1.bf16.msra.mxu1 %v4527_v3  ;;  %2478 = vmatprep.mubr.bf16.mxu1 %v4979_v0 }
 0x707   : > { %2448 = vmatprep.subr.bf16.mxu1 %v4535_v6 }
 0x70a   : > { %2449 = vmatpush1.bf16.msra.mxu1 %v4533_v7 }
 0x70b   : > { %2450 = vmatprep.subr.bf16.mxu1 %v4541_v8 }
 0x70e   : > { %2451 = vmatpush1.bf16.msra.mxu1 %v4539_v11 }
 0x70f   : > { %2452 = vmatprep.subr.bf16.mxu1 %v4547_v1 }
 0x712   : > { %2453 = vmatpush1.bf16.msra.mxu1 %v4545_v12 }
 0x713   : > { %2454 = vmatprep.subr.bf16.mxu1 %v4553_v13 }
 0x716   : > { %2455 = vmatpush1.bf16.msra.mxu1 %v4551_v14 }
 0x717   : > { %2456 = vmatprep.subr.bf16.mxu1 %v4559_v15 }
 0x71a   : > { %2457 = vmatpush1.bf16.msra.mxu1 %v4557_v16 }
 0x71b   : > { %2458 = vmatprep.subr.bf16.mxu1 %v4565_v20 }
 0x71e   : > { %2459 = vmatpush1.bf16.msra.mxu1 %v4563_v19 }
 0x71f   : > { %2460 = vmatprep.subr.bf16.mxu1 %v4571_v24 }
 0x722   : > { %2461 = vmatpush1.bf16.msra.mxu1 %v4569_v25 }
 0x7c5   : > { %v4147_v27 = vpop.f32.mrf.mxu1 }
 0x7c7   : > { %v4148_v28 = vpop.f32.mrf.mxu1 }
 0x7c8   : > { %v4149_v30 = vadd.f32 %v4148_v28, %v4147_v27 }
 0x7c9   : > { %v4150_v31 = vpop.f32.mrf.mxu1 }
 0x7ca   : > { %v5249_v33 = vadd.f32 %v4149_v30, %v1565_v29 }
 0x7cb   : > { %v4151_v34 = vpop.f32.mrf.mxu1 }
 0x7cc   : > { %v2164_v36 = vpack.c.bf16 %v5249_v33, %v5249_v33 }
 0x7ce   : > { %2438 = vmatmul.mubr.bf16.vlgmr.msra.gmra.mxu0 %v2164_v36  ;;  %2479 = vmatmul.mubr.bf16.vlgmr.msra.gmra.mxu1 %v2164_v36 }
 0x7cf   : > { %2488 = vmatpush1.bf16.msra.mxu0 %v4572_v35  ;;  %2519 = vmatprep.mubr.bf16.mxu0 %v4979_v0 }
 0x7d0   : > { %2489 = vmatprep.subr.bf16.mxu0 %v4577_v37 }
 0x7d3   : > { %2490 = vmatpush1.bf16.msra.mxu0 %v4575_v38 }
 0x7d4   : > { %2491 = vmatprep.subr.bf16.mxu0 %v4580_v40 }
 0x7d7   : > { %2492 = vmatpush1.bf16.msra.mxu0 %v4578_v32 }
 0x7d8   : > { %2493 = vmatprep.subr.bf16.mxu0 %v4583_v22 }
 0x7db   : > { %2494 = vmatpush1.bf16.msra.mxu0 %v4581_v41 }
 0x7dc   : > { %2495 = vmatprep.subr.bf16.mxu0 %v4586_v42 }
 0x7df   : > { %2496 = vmatpush1.bf16.msra.mxu0 %v4584_v43 }
 0x7e0   : > { %2497 = vmatprep.subr.bf16.mxu0 %v4589_v44 }
 0x7e3   : > { %2498 = vmatpush1.bf16.msra.mxu0 %v4587_v45 }
 0x7e4   : > { %2499 = vmatprep.subr.bf16.mxu0 %v4592_v46 }
 0x7e7   : > { %2500 = vmatpush1.bf16.msra.mxu0 %v4590_v47 }
 0x7e8   : > { %2501 = vmatprep.subr.bf16.mxu0 %v4595_v48 }
 0x7eb   : > { %2502 = vmatpush1.bf16.msra.mxu0 %v4593_v49 }
 0x7ee   : > { %2520 = vmatmul.mubr.bf16.vlgmr.msra.gmra.mxu0 %v2164_v36 }
 0x88e   : > { %v2439_v50 = vpop.f32.mrf.mxu0  ;;  %v2480_v51 = vpop.f32.mrf.mxu1 }
 0x88f   : > { %2532 = vrot.lane.b32.xlu0 %v2439_v50, %s4980_s25  ;;  %v2528_v15 = vmul.f32 %v2439_v50, %v5192_v9  ;;  %v2530_v25 = vmul.f32 %v2480_v51, %v5192_v9 }
 0x890   : > { %v2441_v52 = vpop.f32.mrf.mxu0  ;;  %v2482_v53 = vpop.f32.mrf.mxu1 }
 0x891   : > { %v2529_v16 = vmul.f32 %v2441_v52, %v5192_v9  ;;  %v2531_v26 = vmul.f32 %v2482_v53, %v5192_v9 }
 0x892   : > { %v2443_v54 = vpop.f32.mrf.mxu0  ;;  %v2484_v55 = vpop.f32.mrf.mxu1 }
 0x893   : > { %2538 = vrot.lane.b32.xlu0 %v2482_v53, %s4980_s25 }
 0x894   : > { %v2444_v56 = vpop.f32.mrf.mxu0  ;;  %v2485_v57 = vpop.f32.mrf.mxu1 }
 0x8ae   : > { %v2521_v58 = vpop.f32.mrf.mxu0 }
 0x8af   : > { %2555 = vrot.lane.b32.xlu1 %v2521_v58, %s4980_s25  ;;  %v2554_v7 = vmul.f32 %v2521_v58, %v5192_v9 }
 0x8b0   : > { %v2523_v59 = vpop.f32.mrf.mxu0 }
 0x8b2   : > { %v2525_v60 = vpop.f32.mrf.mxu0 }
 0x8b3   : > { %2534 = vrot.lane.b32.xlu1 %v2441_v52, %s4980_s25 }
 0x8b4   : > { %v2526_v61 = vpop.f32.mrf.mxu0 }
 0x8b7   : > { %2536 = vrot.lane.b32.xlu1 %v2480_v51, %s4980_s25 }
 0x901   : > { %v2533_v63 = vpop.permute.xlu0 %2532 }
 0x902   : > { %v2540_v3 = vmul.f32 %v2533_v63, %v5180_v5 }
 0x904   : > { %v2544_v1 = vmul.f32 %v2540_v3, %v5194_v10 }
 0x905   : > { %v2539_v6 = vpop.permute.xlu0 %2538 }
 0x906   : > { %v2543_v12 = vmul.f32 %v2539_v6, %v5180_v5  ;;  %v2548_v20 = vadd.f32 %v2544_v1, %v2528_v15  ;;  %v4597_v6 = vld [vmem:[#allocation5 + $0x138] sm:$0xff]   ;;  %v4602_v1 = vld [vmem:[#allocation5 + $0x168] sm:$0xff]  }
 0x907   : > { %v4610_v15 = vld [vmem:[#allocation5 + $0x158] sm:$0xff]  }
 0x908   : > { %v2547_v21 = vmul.f32 %v2543_v12, %v5194_v10  ;;  %v4603_v12 = vld [vmem:[#allocation5 + $0x128] sm:$0xff]  }
 0x90a   : > { %v2551_v29 = vadd.f32 %v2547_v21, %v2531_v26 }
 0x921   : > { %v2556_v2 = vpop.permute.xlu1 %2555 }
 0x922   : > { %v2557_v4 = vmul.f32 %v2556_v2, %v5180_v5 }
 0x924   : > { %v2558_v8 = vmul.f32 %v2557_v4, %v5194_v10  ;;  %v4596_v4 = vld [vmem:[#allocation5 + $0x178] sm:$0xff]  }
 0x925   : > { %v2535_v11 = vpop.permute.xlu1 %2534  ;;  %4161 = vmatprep.subr.bf16.mxu0 %v4596_v4 }
 0x926   : > { %v2541_v13 = vmul.f32 %v2535_v11, %v5180_v5  ;;  %v2559_v14 = vadd.f32 %v2558_v8, %v2554_v7  ;;  %v4598_v7 = vld [vmem:[#allocation5 + $0x170] sm:$0xff]   ;;  %v4600_v8 = vld [vmem:[#allocation5 + $0x1f8] sm:$0xff]   ;;  %4162 = vmatpush3.bf16.msra.mxu0 %v4597_v6 }
 0x927   : > { %v4599_v11 = vld [vmem:[#allocation5 + $0x130] sm:$0xff]   ;;  %4163 = vmatprep.subr.bf16.mxu0 %v4598_v7 }
 0x928   : > { %v2545_v17 = vmul.f32 %v2541_v13, %v5194_v10  ;;  %v2560_v18 = vpack.c.bf16 %v2559_v14, %v2559_v14  ;;  %v4606_v13 = vld [vmem:[#allocation5 + $0x160] sm:$0xff]  }
 0x929   : > { %v2537_v19 = vpop.permute.xlu1 %2536  ;;  %v4607_v14 = vld [vmem:[#allocation5 + $0x120] sm:$0xff]  }
 0x92a   : > { %v2549_v23 = vadd.f32 %v2545_v17, %v2529_v16  ;;  %v2542_v24 = vmul.f32 %v2537_v19, %v5180_v5  ;;  %4241 = vmatprep.subr.bf16.mxu1 %v2560_v18  ;;  %4164 = vmatpush3.bf16.msra.mxu0 %v4599_v11  ;;  %v4611_v16 = vld [vmem:[#allocation5 + $0x118] sm:$0xff]   ;;  %v4614_v17 = vld [vmem:[#allocation5 + $0x150] sm:$0xff]   ;;  %v4618_v19 = vld [vmem:[#allocation5 + $0x148] sm:$0xff]  }
 0x92b   : > { %4242 = vmatpush3.bf16.xpose.msra.mxu1 %v2560_v18  ;;  %4165 = vmatprep.subr.bf16.mxu0 %v4602_v1  ;;  %v4615_v18 = vld [vmem:[#allocation5 + $0x110] sm:$0xff]  }
 0x92c   : > { %v2546_v27 = vmul.f32 %v2542_v24, %v5194_v10  ;;  %4247 = vmatprep.subr.mxu1 %v2523_v59  ;;  %v2552_v28 = vpack.c.bf16 %v2549_v23, %v2548_v20  ;;  %v4619_v20 = vld [vmem:[#allocation5 + $0x108] sm:$0xff]  }
 0x92e   : > { %v2550_v30 = vadd.f32 %v2546_v27, %v2530_v25  ;;  %4243 = vmatprep.mubr.bf16.mxu1 %v2552_v28  ;;  %4166 = vmatpush3.bf16.msra.mxu0 %v4603_v12 }
 0x92f   : > { %4167 = vmatprep.subr.bf16.mxu0 %v4606_v13  ;;  %v4636_v13 = vld [vmem:[#allocation7 + $0x1c4] ss:$16 sps:$4 sm:$0xff]  }
 0x930   : > { %v2553_v31 = vpack.c.bf16 %v2551_v29, %v2550_v30  ;;  %v4601_v29 = vld [vmem:[#allocation5 + $0x1b8] sm:$0xff]  }
 0x932   : > { %4244 = vmatmul.mubr.bf16.vlgmr.msra.gmra.mxu1 %v2553_v31  ;;  %4168 = vmatpush3.bf16.msra.mxu0 %v4607_v14  ;;  %v4604_v31 = vld [vmem:[#allocation5 + $0x1f0] sm:$0xff]   ;;  %v4639_v14 = vld [vmem:[#allocation7 + $0x1cc] ss:$16 sps:$4 sm:$0xff]  }
 0x933   : > { %4248 = vmatpush3.msra.mxu1 %v2523_v59  ;;  %4169 = vmatprep.subr.bf16.mxu0 %v4610_v15  ;;  %v4634_v15 = vld [vmem:[#allocation7 + $0x1c0] ss:$16 sps:$4 sm:$0xff]  }
 0x934   : > { %4183 = vmatprep.subr.bf16.mxu1 %v4600_v8 }
 0x936   : > { %4170 = vmatpush3.bf16.msra.mxu0 %v4611_v16  ;;  %v4637_v16 = vld [vmem:[#allocation7 + $0x1c8] ss:$16 sps:$4 sm:$0xff]  }
 0x937   : > { %4171 = vmatprep.subr.bf16.mxu0 %v4614_v17  ;;  %v4642_v17 = vld [vmem:[#allocation7 + $0x1a4] ss:$16 sps:$4 sm:$0xff]  }
 0x93a   : > { %4172 = vmatpush3.bf16.msra.mxu0 %v4615_v18  ;;  %v4645_v18 = vld [vmem:[#allocation7 + $0x1ac] ss:$16 sps:$4 sm:$0xff]  }
 0x93b   : > { %4173 = vmatprep.subr.bf16.mxu0 %v4618_v19  ;;  %v4640_v19 = vld [vmem:[#allocation7 + $0x1a0] ss:$16 sps:$4 sm:$0xff]  }
 0x93e   : > { %4174 = vmatpush3.bf16.msra.mxu0 %v4619_v20  ;;  %v4643_v20 = vld [vmem:[#allocation7 + $0x1a8] ss:$16 sps:$4 sm:$0xff]  }
 0x9f2   : > { %v4245_v34 = vpop.f32.mrf.mxu1 }
 0x9f3   : > { %v2612_v32 = vmul.f32 0.088388346, %v4245_v34 }
 0x9f4   : > { %v2595_v35 = vpop.f32.mrf.mxu1 }
 0x9f5   : > { %v2610_v36 = vmul.f32 0.088388346, %v2595_v35  ;;  %v2616_v44 = vadd.f32 %v2612_v32, %v5213_v39  ;;  %v4612_v32 = vld [vmem:[#allocation5 + $0x1e0] sm:$0xff]  }
 0x9f6   : > { %v4246_v5 = vpop.f32.mrf.mxu1 }
 0x9f7   : > { %v2613_v37 = vmul.f32 0.088388346, %v4246_v5  ;;  %v2614_v38 = vadd.f32 %v2610_v36, %v5213_v39  ;;  %v2624_v45 = vsel %vm1147_vm1, %v2616_v44, -inf  ;;  %v4605_v5 = vld [vmem:[#allocation5 + $0x1b0] sm:$0xff]  }
 0x9f8   : > { %v2598_v40 = vpop.f32.mrf.mxu1 }
 0x9f9   : > { %v2611_v9 = vmul.f32 0.088388346, %v2598_v40  ;;  %v2618_v10 = vsel %vm1147_vm1, %v2614_v38, -inf  ;;  %v2617_v22 = vadd.f32 %v2613_v37, %v5213_v39  ;;  %v4609_v40 = vld [vmem:[#allocation5 + $0x1a8] sm:$0xff]  }
 0x9fa   : > { %2619 = vmax.xlane.f32.xlu1 %v2618_v10  ;;  %v4616_v10 = vld [vmem:[#allocation5 + $0x1d8] sm:$0xff]  }
 0x9fb   : > { %v2615_v41 = vadd.f32 %v2611_v9, %v5213_v39  ;;  %v2627_v42 = vsel %vm1147_vm1, %v2617_v22, -inf  ;;  %v4613_v9 = vld [vmem:[#allocation5 + $0x1a0] sm:$0xff]  }
 0x9fd   : > { %v2621_v43 = vsel %vm1147_vm1, %v2615_v41, -inf }
 0x9fe   : > { %2628 = vmax.xlane.f32.xlu1 %v2627_v42  ;;  %2622 = vmax.xlane.f32.xlu0 %v2621_v43  ;;  %v4621_v42 = vld [vmem:[#allocation5 + $0x190] sm:$0xff]   ;;  %v4622_v43 = vld [vmem:[#allocation5 + $0x140] sm:$0xff]  }
 0x9ff   : > { %4175 = vmatprep.subr.bf16.mxu0 %v4622_v43 }
 0xa02   : > { %2625 = vmax.xlane.f32.xlu0 %v2624_v45  ;;  %v4624_v45 = vld [vmem:[#allocation5 + $0x1c8] sm:$0xff]  }
 0xa83   : > { %v2620_v46 = vpop.xlane.xlu1 %2619 }
 0xa84   : > { %v2630_v47 = vsub.f32 %v2614_v38, %v2620_v46  ;;  %v4608_v38 = vld [vmem:[#allocation5 + $0x1e8] sm:$0xff]  }
 0xa85   : > { %v4625_v46 = vld [vmem:[#allocation5 + $0x188] sm:$0xff]  }
 0xa86   : > { %v2634_v48 = vmul.f32 1.442695, %v2630_v47  ;;  %v4626_v47 = vld [vmem:[#allocation5 + $0x1c0] sm:$0xff]  }
 0xa87   : > { %v2629_v49 = vpop.xlane.xlu1 %2628  ;;  %v2623_v50 = vpop.xlane.xlu0 %2622 }
 0xa88   : > { %4738 = vpow2.f32 %v2634_v48  ;;  %v2633_v51 = vsub.f32 %v2617_v22, %v2629_v49  ;;  %v2631_v52 = vsub.f32 %v2615_v41, %v2623_v50  ;;  %v4617_v22 = vld [vmem:[#allocation5 + $0x198] sm:$0xff]   ;;  %v4620_v41 = vld [vmem:[#allocation5 + $0x1d0] sm:$0xff]   ;;  %v4627_v48 = vld [vmem:[#allocation5 + $0x180] sm:$0xff]  }
 0xa8a   : > { %v2636_v53 = vmul.f32 1.442695, %v2631_v52  ;;  %v2640_v54 = vmul.f32 1.442695, %v2633_v51 }
 0xa8b   : > { %v2626_v55 = vpop.xlane.xlu0 %2625 }
 0xa8c   : > { %v2632_v56 = vsub.f32 %v2616_v44, %v2626_v55  ;;  %4740 = vpow2.f32 %v2636_v53  ;;  %v4623_v44 = vld [vmem:[#allocation5 + $0x100] sm:$0xff]  }
 0xa8d   : > { %4742 = vpow2.f32 %v2640_v54  ;;  %4176 = vmatpush3.bf16.msra.mxu0 %v4623_v44  ;;  %v3924_v44 = vld [vmem:[%s5360_s6 + $0x1] sm:$0x1] }
 0xa8e   : > { %v2638_v57 = vmul.f32 1.442695, %v2632_v56 }
 0xa90   : > { %4744 = vpow2.f32 %v2638_v57  ;;  %v4628_v57 = vld [vmem:[#allocation7 + $0x1e0] ss:$16 sps:$4 sm:$0xff]  }
 0xa95   : > { %v4739_v39 = vpop.eup %4738 }
 0xa96   : > { %v2642_v58 = vsel %vm1147_vm1, %v4739_v39, 0.0 }
 0xa97   : > { %2643 = vadd.xlane.f32.xlu0 %v2642_v58  ;;  %v4631_v58 = vld [vmem:[#allocation7 + $0x1e8] ss:$16 sps:$4 sm:$0xff]  }
 0xa99   : > { %v4741_v59 = vpop.eup %4740 }
 0xa9a   : > { %v2645_v60 = vsel %vm1147_vm1, %v4741_v59, 0.0  ;;  %v4743_v61 = vpop.eup %4742 }
 0xa9b   : > { %2646 = vadd.xlane.f32.xlu1 %v2645_v60  ;;  %v2651_v3 = vsel %vm1147_vm1, %v4743_v61, 0.0 }
 0xa9d   : > { %v4745_v63 = vpop.eup %4744 }
 0xa9e   : > { %v2648_v2 = vsel %vm1147_vm1, %v4745_v63, 0.0 }
 0xa9f   : > { %2649 = vadd.xlane.f32.xlu0 %v2648_v2  ;;  %2652 = vadd.xlane.f32.xlu1 %v2651_v3 }
 0xb20   : > { %v2644_v21 = vpop.xlane.xlu0 %2643 }
 0xb21   : > { %4746 = vrcp.f32 %v2644_v21  ;;  %v4648_v21 = vld [vmem:[#allocation7 + $0x184] ss:$16 sps:$4 sm:$0xff]  }
 0xb24   : > { %v2647_v23 = vpop.xlane.xlu1 %2646 }
 0xb25   : > { %4748 = vrcp.f32 %v2647_v23  ;;  %v4651_v23 = vld [vmem:[#allocation7 + $0x18c] ss:$16 sps:$4 sm:$0xff]  }
 0xb28   : > { %v2650_v24 = vpop.xlane.xlu0 %2649  ;;  %v2653_v25 = vpop.xlane.xlu1 %2652 }
 0xb29   : > { %4750 = vrcp.f32 %v2650_v24  ;;  %v4646_v24 = vld [vmem:[#allocation7 + $0x180] ss:$16 sps:$4 sm:$0xff]  }
 0xb2a   : > { %4752 = vrcp.f32 %v2653_v25  ;;  %v4649_v25 = vld [vmem:[#allocation7 + $0x188] ss:$16 sps:$4 sm:$0xff]  }
 0xb2e   : > { %v4747_v26 = vpop.eup %4746 }
 0xb2f   : > { %v2658_v27 = vmul.f32 %v4747_v26, %v4739_v39  ;;  %v4630_v39 = vld [vmem:[#allocation7 + $0x1e4] ss:$16 sps:$4 sm:$0xff]  }
 0xb30   : > { %3218 = vmatprep.subr.bf16.mxu0 %v4630_v39  ;;  %v4654_v26 = vld [vmem:[#allocation7 + $0x164] ss:$16 sps:$4 sm:$0xff]   ;;  %v4680_v39 = vld [vmem:[#allocation8 + $0xe8] sm:$0xff]  }
 0xb31   : > { %4249 = vmatprep.mubr.msk.f32.mxu1 %vm1147_vm1, %v2658_v27  ;;  %v4657_v27 = vld [vmem:[#allocation7 + $0x16c] ss:$16 sps:$4 sm:$0xff]  }
 0xb32   : > { %v4749_v28 = vpop.eup %4748 }
 0xb33   : > { %v2659_v30 = vmul.f32 %v4749_v28, %v4741_v59  ;;  %v4633_v59 = vld [vmem:[#allocation7 + $0x1ec] ss:$16 sps:$4 sm:$0xff]   ;;  %v4652_v28 = vld [vmem:[#allocation7 + $0x160] ss:$16 sps:$4 sm:$0xff]  }
 0xb35   : > { %4250 = vmatmul.mubr.msk.f32.vlgmr.msra.gmra.mxu1 %vm1147_vm1, %v2659_v30  ;;  %v4660_v30 = vld [vmem:[#allocation7 + $0x144] ss:$16 sps:$4 sm:$0xff]  }
 0xb36   : > { %v4751_v34 = vpop.eup %4750  ;;  %4184 = vmatpush3.bf16.msra.mxu1 %v4601_v29  ;;  %v4655_v29 = vld [vmem:[#allocation7 + $0x168] ss:$16 sps:$4 sm:$0xff]  }
 0xb37   : > { %v4753_v35 = vpop.eup %4752  ;;  %v2660_v36 = vmul.f32 %v4751_v34, %v4745_v63  ;;  %4185 = vmatprep.subr.bf16.mxu1 %v4604_v31  ;;  %v4663_v31 = vld [vmem:[#allocation7 + $0x14c] ss:$16 sps:$4 sm:$0xff]   ;;  %v4658_v34 = vld [vmem:[#allocation7 + $0x140] ss:$16 sps:$4 sm:$0xff]  }
 0xb38   : > { %v2661_v37 = vmul.f32 %v4753_v35, %v4743_v61  ;;  %v4661_v35 = vld [vmem:[#allocation7 + $0x148] ss:$16 sps:$4 sm:$0xff]  }
 0xb39   : > { %4252 = vmatprep.mubr.msk.f32.mxu1 %vm1147_vm1, %v2660_v36  ;;  %v4666_v36 = vld [vmem:[#allocation7 + $0x124] ss:$16 sps:$4 sm:$0xff]  }
 0xb3a   : > { %4253 = vmatmul.mubr.msk.f32.gmra.mxu1 %vm1147_vm1, %v2661_v37  ;;  %v4664_v37 = vld [vmem:[#allocation7 + $0x120] ss:$16 sps:$4 sm:$0xff]  }
 0xb3b   : > { %4186 = vmatpush3.bf16.msra.mxu1 %v4605_v5  ;;  %v4669_v5 = vld [vmem:[#allocation7 + $0x12c] ss:$16 sps:$4 sm:$0xff]  }
 0xb3c   : > { %4187 = vmatprep.subr.bf16.mxu1 %v4608_v38  ;;  %v4667_v38 = vld [vmem:[#allocation7 + $0x128] ss:$16 sps:$4 sm:$0xff]  }
 0xb3f   : > { %4188 = vmatpush3.bf16.msra.mxu1 %v4609_v40  ;;  %v4672_v40 = vld [vmem:[#allocation7 + $0x104] ss:$16 sps:$4 sm:$0xff]  }
 0xb40   : > { %4189 = vmatprep.subr.bf16.mxu1 %v4612_v32  ;;  %v4675_v32 = vld [vmem:[#allocation7 + $0x10c] ss:$16 sps:$4 sm:$0xff]  }
 0xb43   : > { %4190 = vmatpush3.bf16.msra.mxu1 %v4613_v9  ;;  %v4670_v9 = vld [vmem:[#allocation7 + $0x100] ss:$16 sps:$4 sm:$0xff]  }
 0xb44   : > { %4191 = vmatprep.subr.bf16.mxu1 %v4616_v10  ;;  %v4673_v10 = vld [vmem:[#allocation7 + $0x108] ss:$16 sps:$4 sm:$0xff]  }
 0xb47   : > { %4192 = vmatpush3.bf16.msra.mxu1 %v4617_v22  ;;  %v4676_v22 = vld [vmem:[#allocation8 + $0xf8] sm:$0xff]  }
 0xb48   : > { %4193 = vmatprep.subr.bf16.mxu1 %v4620_v41 }
 0xb4b   : > { %4194 = vmatpush3.bf16.msra.mxu1 %v4621_v42 }
 0xb4c   : > { %4195 = vmatprep.subr.bf16.mxu1 %v4624_v45  ;;  %v3049_v45 = vadd.f32 1.0, %v3924_v44  ;;  %v4698_v44 = vld [vmem:[#allocation10 + $0x50] ss:$8 sps:$4 sm:$0xff]  }
 0xb4f   : > { %4196 = vmatpush3.bf16.msra.mxu1 %v4625_v46 }
 0xb50   : > { %4197 = vmatprep.subr.bf16.mxu1 %v4626_v47 }
 0xb53   : > { %4198 = vmatpush3.bf16.msra.mxu1 %v4627_v48 }
 0xb54   : > { %3259 = vmatprep.subr.bf16.mxu1 %v4633_v59  ;;  %v4682_v59 = vld [vmem:[#allocation8 + $0xe0] sm:$0xff]  }
 0xbf5   : > { %v4251_v49 = vpop.f32.mrf.mxu1 }
 0xbf6   : > { %v2760_v50 = vpack.c.bf16 %v4251_v49, %v4251_v49 }
 0xbf7   : > { %v2740_v51 = vpop.f32.mrf.mxu1 }
 0xbf8   : > { %v2759_v52 = vpack.c.bf16 %v2740_v51, %v2740_v51  ;;  %2987 = vmatprep.mubr.bf16.mxu0 %v2760_v50  ;;  %v3054_v50 = vrot.slane %v3049_v45, %v5241_v62  ;;  %v4703_v45 = vld [vmem:[#allocation10 + $0x44] ss:$8 sps:$4 sm:$0xff]  }
 0xbfa   : > { %v4254_v53 = vpop.f32.mrf.mxu1  ;;  %2988 = vmatmul.mubr.bf16.vlgmr.msra.gmra.mxu0 %v2759_v52 }
 0xbfb   : > { %v2762_v54 = vpack.c.bf16 %v4254_v53, %v4254_v53  ;;  %3250 = vmatprep.mubr.bf16.mxu0 %v4979_v0  ;;  %3219 = vmatpush1.bf16.msra.mxu0 %v4628_v57  ;;  %v4679_v57 = vld [vmem:[#allocation8 + $0xb0] sm:$0xff]  }
 0xbfc   : > { %v2750_v55 = vpop.f32.mrf.mxu1  ;;  %3220 = vmatprep.subr.bf16.mxu0 %v4636_v13 }
 0xbfd   : > { %v2761_v56 = vpack.c.bf16 %v2750_v55, %v2750_v55  ;;  %3027 = vmatprep.mubr.bf16.mxu1 %v2762_v54  ;;  %v4677_v54 = vld [vmem:[#allocation8 + $0xb8] sm:$0xff]  }
 0xbff   : > { %3028 = vmatmul.mubr.bf16.vlgmr.msra.gmra.mxu1 %v2761_v56  ;;  %3221 = vmatpush1.bf16.msra.mxu0 %v4634_v15  ;;  %v4678_v56 = vld [vmem:[#allocation8 + $0xf0] sm:$0xff]  }
 0xc00   : > { %3291 = vmatprep.mubr.bf16.mxu1 %v4979_v0  ;;  %3260 = vmatpush1.bf16.msra.mxu1 %v4631_v58  ;;  %v4681_v58 = vld [vmem:[#allocation8 + $0xa8] sm:$0xff]  }
 0xc01   : > { %3261 = vmatprep.subr.bf16.mxu1 %v4639_v14  ;;  %3222 = vmatprep.subr.bf16.mxu0 %v4642_v17 }
 0xc03   : > { %3223 = vmatpush1.bf16.msra.mxu0 %v4640_v19 }
 0xc04   : > { %3262 = vmatpush1.bf16.msra.mxu1 %v4637_v16  ;;  %3224 = vmatprep.subr.bf16.mxu0 %v4648_v21 }
 0xc05   : > { %3263 = vmatprep.subr.bf16.mxu1 %v4645_v18 }
 0xc07   : > { %3225 = vmatpush1.bf16.msra.mxu0 %v4646_v24 }
 0xc08   : > { %3264 = vmatpush1.bf16.msra.mxu1 %v4643_v20  ;;  %3226 = vmatprep.subr.bf16.mxu0 %v4654_v26 }
 0xc09   : > { %3265 = vmatprep.subr.bf16.mxu1 %v4651_v23 }
 0xc0b   : > { %3227 = vmatpush1.bf16.msra.mxu0 %v4652_v28 }
 0xc0c   : > { %3266 = vmatpush1.bf16.msra.mxu1 %v4649_v25  ;;  %3228 = vmatprep.subr.bf16.mxu0 %v4660_v30 }
 0xc0d   : > { %3267 = vmatprep.subr.bf16.mxu1 %v4657_v27 }
 0xc0f   : > { %3229 = vmatpush1.bf16.msra.mxu0 %v4658_v34 }
 0xc10   : > { %3268 = vmatpush1.bf16.msra.mxu1 %v4655_v29  ;;  %3230 = vmatprep.subr.bf16.mxu0 %v4666_v36  ;;  %v4694_v36 = vld [vmem:[#allocation10 + $0x74] ss:$8 sps:$4 sm:$0xff]  }
 0xc11   : > { %3269 = vmatprep.subr.bf16.mxu1 %v4663_v31 }
 0xc13   : > { %3231 = vmatpush1.bf16.msra.mxu0 %v4664_v37 }
 0xc14   : > { %3270 = vmatpush1.bf16.msra.mxu1 %v4661_v35  ;;  %3232 = vmatprep.subr.bf16.mxu0 %v4672_v40  ;;  %v4692_v35 = vld [vmem:[#allocation10 + $0x70] ss:$8 sps:$4 sm:$0xff]  }
 0xc15   : > { %3271 = vmatprep.subr.bf16.mxu1 %v4669_v5 }
 0xc17   : > { %3233 = vmatpush1.bf16.msra.mxu0 %v4670_v9 }
 0xc18   : > { %3272 = vmatpush1.bf16.msra.mxu1 %v4667_v38  ;;  %4205 = vmatprep.subr.bf16.mxu0 %v4676_v22 }
 0xc19   : > { %3273 = vmatprep.subr.bf16.mxu1 %v4675_v32 }
 0xc1c   : > { %3274 = vmatpush1.bf16.msra.mxu1 %v4673_v10 }
 0xc1d   : > { %3570 = vmatprep.subr.bf16.mxu1 %v4694_v36 }
 0xcba   : > { %v4177_v60 = vpop.f32.mrf.mxu0 }
 0xcbc   : > { %v4178_v61 = vpop.f32.mrf.mxu0 }
 0xcbd   : > { %v4179_v6 = vadd.f32 %v4178_v61, %v4177_v60  ;;  %v4683_v60 = vld [vmem:[#allocation8 + $0xa0] sm:$0xff]   ;;  %v4684_v61 = vld [vmem:[#allocation8 + $0xd8] sm:$0xff]  }
 0xcbe   : > { %v4180_v63 = vpop.f32.mrf.mxu0 }
 0xcbf   : > { %v4199_v2 = vpop.f32.mrf.mxu1  ;;  %v4685_v63 = vld [vmem:[#allocation8 + $0x98] sm:$0xff]  }
 0xcc0   : > { %v4181_v3 = vpop.f32.mrf.mxu0 }
 0xcc1   : > { %v4200_v4 = vpop.f32.mrf.mxu1  ;;  %v4687_v3 = vld [vmem:[#allocation8 + $0x90] sm:$0xff]  }
 0xcc2   : > { %v4201_v7 = vadd.f32 %v4200_v4, %v4199_v2  ;;  %v4686_v2 = vld [vmem:[#allocation8 + $0xd0] sm:$0xff]   ;;  %v4689_v4 = vld [vmem:[#allocation8 + $0x88] sm:$0xff]  }
 0xcc3   : > { %v4202_v8 = vpop.f32.mrf.mxu1 }
 0xcc4   : > { %v5292_v11 = vadd.f32 %v4201_v7, %v4179_v6  ;;  %v4690_v6 = vld [vmem:[#allocation8 + $0xc0] sm:$0xff]  }
 0xcc5   : > { %v4203_v1 = vpop.f32.mrf.mxu1  ;;  %v4691_v7 = vld [vmem:[#allocation8 + $0x80] sm:$0xff]  }
 0xcc6   : > { %v3036_v12 = vmul.f32 %v5292_v11, %v5292_v11  ;;  %v3035_v38 = vadd.f32 %v5292_v11, %v5249_v33  ;;  %v4704_v33 = vld [vmem:[#allocation10 + $0x30] ss:$8 sps:$4 sm:$0xff]  }
 0xcc8   : > { %3037 = vadd.xlane.f32.xlu0 %v3036_v12 }
 0xd51   : > { %v3038_v41 = vpop.xlane.xlu0 %3037 }
 0xd52   : > { %v3039_v42 = vmul.f32 0.0078125, %v3038_v41  ;;  %v4697_v41 = vld [vmem:[#allocation10 + $0x64] ss:$8 sps:$4 sm:$0xff]  }
 0xd54   : > { %v3040_v43 = vadd.f32 1e-06, %v3039_v42  ;;  %v4695_v42 = vld [vmem:[#allocation10 + $0x60] ss:$8 sps:$4 sm:$0xff]  }
 0xd56   : > { %4754 = vrsqrt.f32 %v3040_v43  ;;  %vm3043_vm4 = vcmp.eq.f32.partialorder %v3040_v43, inf  ;;  %v3046_v48 = vand.u32 2147483648, %v3040_v43  ;;  %vm3045_vm5 = vcmp.eq.f32.partialorder %v3040_v43, 0.0 }
 0xd63   : > { %v4755_v46 = vpop.eup %4754 }
 0xd64   : > { %v3042_v47 = vmul.f32 %v4755_v46, %v3040_v43  ;;  %v4701_v46 = vld [vmem:[#allocation10 + $0x40] ss:$8 sps:$4 sm:$0xff]  }
 0xd66   : > { %v3044_v49 = vsel %vm3043_vm4, %v3040_v43, %v3042_v47  ;;  %v4700_v43 = vld [vmem:[#allocation10 + $0x54] ss:$8 sps:$4 sm:$0xff]  }
 0xd67   : > { %v3047_v51 = vsel %vm3045_vm5, %v3046_v48, %v3044_v49  ;;  %v4706_v47 = vld [vmem:[#allocation10 + $0x34] ss:$8 sps:$4 sm:$0xff]   ;;  %v4707_v48 = vld [vmem:[#allocation10 + $0x20] ss:$8 sps:$4 sm:$0xff]  }
 0xd68   : > { %v3048_v52 = vmul.f32 %v3047_v51, %v5292_v11  ;;  %v4709_v11 = vld [vmem:[#allocation10 + $0x24] ss:$8 sps:$4 sm:$0xff]   ;;  %v4712_v49 = vld [vmem:[#allocation10 + $0x14] ss:$8 sps:$4 sm:$0xff]  }
 0xd69   : > { %v4715_v51 = vld [vmem:[#allocation10 + $0x4] ss:$8 sps:$4 sm:$0xff]  }
 0xd6a   : > { %v3056_v53 = vmul.f32 %v3054_v50, %v3048_v52  ;;  %v4710_v50 = vld [vmem:[#allocation10 + $0x10] ss:$8 sps:$4 sm:$0xff]   ;;  %v4713_v52 = vld [vmem:[#allocation10] ss:$8 sps:$4 sm:$0xff]  }
 0xd6c   : > { %v3057_v55 = vpack.c.bf16 %v3056_v53, %v3056_v53 }
 0xd6e   : > { %3251 = vmatmul.mubr.bf16.vlgmr.msra.gmra.mxu0 %v3057_v55  ;;  %3292 = vmatmul.mubr.bf16.vlgmr.msra.gmra.mxu1 %v3057_v55 }
 0xd6f   : > { %4206 = vmatpush3.bf16.msra.mxu0 %v4677_v54  ;;  %3602 = vmatprep.mubr.bf16.mxu1 %v4979_v0  ;;  %v4688_v0 = vld [vmem:[#allocation8 + $0xc8] sm:$0xff]  }
 0xd70   : > { %4207 = vmatprep.subr.bf16.mxu0 %v4678_v56  ;;  %3571 = vmatpush1.bf16.msra.mxu1 %v4692_v35  ;;  %v3464_v56 = vld [vmem:[%s5363_s9] sm:$0x1] }
 0xd71   : > { %3572 = vmatprep.subr.bf16.mxu1 %v4697_v41 }
 0xd73   : > { %4208 = vmatpush3.bf16.msra.mxu0 %v4679_v57  ;;  %v3465_v57 = vadd.f32 1.0, %v3464_v56 }
 0xd74   : > { %4209 = vmatprep.subr.bf16.mxu0 %v4680_v39  ;;  %3573 = vmatpush1.bf16.msra.mxu1 %v4695_v42 }
 0xd75   : > { %3574 = vmatprep.subr.bf16.mxu1 %v4700_v43 }
 0xd77   : > { %4210 = vmatpush3.bf16.msra.mxu0 %v4681_v58 }
 0xd78   : > { %4211 = vmatprep.subr.bf16.mxu0 %v4682_v59  ;;  %3575 = vmatpush1.bf16.msra.mxu1 %v4698_v44 }
 0xd79   : > { %3576 = vmatprep.subr.bf16.mxu1 %v4703_v45 }
 0xd7b   : > { %4212 = vmatpush3.bf16.msra.mxu0 %v4683_v60 }
 0xd7c   : > { %4213 = vmatprep.subr.bf16.mxu0 %v4684_v61  ;;  %3577 = vmatpush1.bf16.msra.mxu1 %v4701_v46  ;;  %v3470_v61 = vrot.slane %v3465_v57, %v5241_v62 }
 0xd7d   : > { %3578 = vmatprep.subr.bf16.mxu1 %v4706_v47 }
 0xd7f   : > { %4214 = vmatpush3.bf16.msra.mxu0 %v4685_v63 }
 0xd80   : > { %4215 = vmatprep.subr.bf16.mxu0 %v4686_v2  ;;  %3579 = vmatpush1.bf16.msra.mxu1 %v4704_v33 }
 0xd81   : > { %3580 = vmatprep.subr.bf16.mxu1 %v4709_v11 }
 0xd83   : > { %4216 = vmatpush3.bf16.msra.mxu0 %v4687_v3 }
 0xd84   : > { %4217 = vmatprep.subr.bf16.mxu0 %v4688_v0  ;;  %3581 = vmatpush1.bf16.msra.mxu1 %v4707_v48 }
 0xd85   : > { %3582 = vmatprep.subr.bf16.mxu1 %v4712_v49 }
 0xd87   : > { %4218 = vmatpush3.bf16.msra.mxu0 %v4689_v4 }
 0xd88   : > { %4219 = vmatprep.subr.bf16.mxu0 %v4690_v6  ;;  %3583 = vmatpush1.bf16.msra.mxu1 %v4710_v50 }
 0xd89   : > { %3584 = vmatprep.subr.bf16.mxu1 %v4715_v51 }
 0xd8b   : > { %4220 = vmatpush3.bf16.msra.mxu0 %v4691_v7 }
 0xd8c   : > { %3585 = vmatpush1.bf16.msra.mxu1 %v4713_v52 }
 0xe2e   : > { %v3252_v8 = vpop.f32.mrf.mxu0  ;;  %v3293_v1 = vpop.f32.mrf.mxu1 }
 0xe2f   : > { %v3302_v12 = vmul.f32 0.70710677, %v3252_v8  ;;  %v3300_v21 = vmul.f32 0.5, %v3252_v8 }
 0xe30   : > { %v3254_v13 = vpop.f32.mrf.mxu0  ;;  %v3295_v14 = vpop.f32.mrf.mxu1 }
 0xe31   : > { %4756 = verf.f32 %v3302_v12  ;;  %v3303_v15 = vmul.f32 0.70710677, %v3254_v13  ;;  %v3301_v26 = vmul.f32 0.5, %v3254_v13 }
 0xe32   : > { %v3256_v16 = vpop.f32.mrf.mxu0  ;;  %v3297_v17 = vpop.f32.mrf.mxu1 }
 0xe33   : > { %4758 = verf.f32 %v3303_v15 }
 0xe34   : > { %v3257_v18 = vpop.f32.mrf.mxu0  ;;  %v3298_v19 = vpop.f32.mrf.mxu1 }
 0xe3e   : > { %v4757_v20 = vpop.eup %4756 }
 0xe3f   : > { %v3306_v23 = vadd.f32 1.0, %v4757_v20 }
 0xe40   : > { %v4759_v24 = vpop.eup %4758 }
 0xe41   : > { %v3308_v25 = vmul.f32 %v3306_v23, %v3300_v21  ;;  %v3307_v27 = vadd.f32 1.0, %v4759_v24 }
 0xe43   : > { %v3309_v28 = vmul.f32 %v3307_v27, %v3301_v26  ;;  %v3310_v29 = vmul.f32 %v3308_v25, %v3293_v1 }
 0xe45   : > { %v3311_v30 = vmul.f32 %v3309_v28, %v3295_v14  ;;  %v3312_v34 = vpack.c.bf16 %v3310_v29, %v3310_v29 }
 0xe47   : > { %v3313_v31 = vpack.c.bf16 %v3311_v30, %v3311_v30 }
 0xe49   : > { %3442 = vmatprep.mubr.bf16.mxu0 %v3313_v31 }
 0xe4a   : > { %3443 = vmatmul.mubr.bf16.vlgmr.msra.gmra.mxu0 %v3312_v34 }
 0xf0a   : > { %v4221_v5 = vpop.f32.mrf.mxu0 }
 0xf0c   : > { %v4222_v37 = vpop.f32.mrf.mxu0 }
 0xf0d   : > { %v4223_v40 = vadd.f32 %v4222_v37, %v4221_v5 }
 0xf0e   : > { %v4224_v32 = vpop.f32.mrf.mxu0 }
 0xf0f   : > { %v3450_v9 = vadd.f32 %v4223_v40, %v3035_v38 }
 0xf10   : > { %v4225_v10 = vpop.f32.mrf.mxu0 }
 0xf11   : > { %v3451_v22 = vmul.f32 %v3450_v9, %v3450_v9 }
 0xf13   : > { %3452 = vadd.xlane.f32.xlu1 %v3451_v22 }
 0xf9c   : > { %v3453_v53 = vpop.xlane.xlu1 %3452 }
 0xf9d   : > { %v3454_v54 = vmul.f32 0.0078125, %v3453_v53 }
 0xf9f   : > { %v3455_v55 = vadd.f32 1e-06, %v3454_v54 }
 0xfa1   : > { %4760 = vrsqrt.f32 %v3455_v55  ;;  %vm3458_vm6 = vcmp.eq.f32.partialorder %v3455_v55, inf  ;;  %v3461_v59 = vand.u32 2147483648, %v3455_v55  ;;  %vm3460_vm7 = vcmp.eq.f32.partialorder %v3455_v55, 0.0 }
 0xfae   : > { %v4761_v39 = vpop.eup %4760 }
 0xfaf   : > { %v3457_v58 = vmul.f32 %v4761_v39, %v3455_v55 }
 0xfb1   : > { %v3459_v60 = vsel %vm3458_vm6, %v3455_v55, %v3457_v58 }
 0xfb2   : > { %v3462_v63 = vsel %vm3460_vm7, %v3461_v59, %v3459_v60 }
 0xfb3   : > { %v3463_v2 = vmul.f32 %v3462_v63, %v3450_v9 }
 0xfb5   : > { %v3472_v3 = vmul.f32 %v3470_v61, %v3463_v2 }
 0xfb7   : > { %v3473_v0 = vpack.c.bf16 %v3472_v3, %v3472_v3 }
 0xfb9   : > { %3603 = vmatmul.mubr.bf16.vlgmr.msra.gmra.mxu1 %v3473_v0 }
0x1079   : > { %v3604_v4 = vpop.f32.mrf.mxu1 }
0x107a   : > { %3611 = vst [vmem:[%s489_s12] sm:$0xff] %v3604_v4 }
0x107b   : > { %v3606_v62 = vpop.f32.mrf.mxu1 }
0x107c   : > { %3612 = vst [vmem:[%s489_s12 + $0x8] sm:$0xff] %v3606_v62 }
0x107d   : > { %v3608_v6 = vpop.f32.mrf.mxu1 }
0x107e   : > { %4905 = shalt.err (!%p4902_p1)
}
0x107f   : > { %s4906_s25 = scalar_lea.hbm %s5315_s4, 256  ;;  %s4910_s19 = scalar_lea.hbm %s5365_s11, 512 }
0x1080   : > { %p4907_p13 = scmp.ne.s32.totalorder %s5315_s4, %s4906_s25  ;;  %p4911_p2 = scmp.lt.s32.totalorder %s5315_s4, %s5365_s11 }
0x1081   : > { %p4912_p12 = scmp.lt.s32.totalorder %s4910_s19, %s4906_s25 }
0x1082   : > { %p4908_p3 = pnand %p4907_p13, %p5389_p8 }
0x1083   : > { %p4913_p4 = por %p4912_p12, %p4911_p2 }
0x1084   : > { %p4909_p10 = pneg %p4908_p3 }
0x1086   : > { %p4914_p7 = pnand %p4913_p4, %p4909_p10 }
0x1088   : > { %4917 = shalt.err (!%p4914_p7)
}
0x1089   : > { %4275 = dma.vmem_to_hbm [thread:$0]  (%p5389_p8), %s5310_s23, 256, %s5315_s4, %s3614_s29   ;;  %v3609_v7 = vpop.f32.mrf.mxu1 }
0x108a PF: > { %p4307_p9 = scmp.ge.s32.totalorder %s4964_s20, 2  ;;  %s3640_s14 = sand.u32 1, %s4952_s17  }
0x108b   : > { %p5390_p11 = scmp.ne.s32.totalorder %s5377_s28, 0  ;;  %s3641_s16 = scalar_lea.sflag [#allocation4], %s3640_s14 }
0x108d   : > { %p4294_p5 = pnand %p4307_p9, %p5390_p11 }
0x108f   : > { %p4295_p6 = pneg %p4294_p5 }
0x1091   : > { %4947 = dma.done.wait (%p4295_p6), %s3641_s16, 256  }
0x1092   : > { %4949 = vsyncadd (%p4295_p6), %s3641_s16, 4294967040  ;;  %s5391_s20 = sld [smem:[#allocation17_spill]]  ;;  %s5394_s17 = smov %s4956_s18 }
0x1093   : > { %s5392_s13 = sld [smem:[#allocation16_spill]] }
0x1094   : > { %s5393_s19 = sld [smem:[#allocation18_spill]] }
0x1098   : > { %p24_p0 = scmp.ge.s32.totalorder %s5391_s20, 4  }
0x1099   : > { %s5395_s18 = smov %s5392_s13 }
0x109a   :  { %26 = sbr.rel (!%p24_p0) target bundleno = 8 (0x8), region = 134 }
0x109f   :  { %3646 = vsyncpa [#allocation3], 1 }
0x10a0   :  { %3648 = vsyncpa [#allocation3 + $0x1], 1 }
0x10a1   :  { %3649 = vsyncpa [#allocation6], 1 }
0x10a2   :  { %3650 = vsyncpa [#allocation9], 1 }
0x10a3   :  { %3651 = vsyncpa [#allocation4], 1 }
0x10a4   :  { %3653 = vsyncpa [#allocation4 + $0x1], 1 }

</bundles_post_ra>
